<compile_context>
chip_gen: v7x
topology: tpu7x:2x2x1
jax: 0.10.0
libtpu: 0.0.40
codegen_flags: <defaults>
</compile_context>

<pallas_src>
import functools

import jax
import jax.numpy as jnp
from jax.experimental import pallas as pl
from jax.experimental.pallas import tpu as pltpu


# ----------------------------- config ---------------------------------------
class Config:
    embed_size = 32
    hidden_size = 32
    hidden_layers = 2
    bidirectional = True
    dropout_keep = 0.5       # unused at inference
    output_size = 4          # AG News: 4 classes


VOCAB_SIZE = 50
SEQ_LEN = 8
BATCH = 2

# Fused gate order: sigmoid gates first (i, f, o), tanh gate (g) last, so one sigmoid
# covers lanes [0, 6H) and one tanh covers [6H, 8H).
_GATE_ORDER = (0, 1, 3, 2)   # indices into the PyTorch (i, f, g, o) gate axis


# ----------------------- weight layout helpers (plain JAX, one-time) ---------
def fuse_gates(a_f, a_b, H):
    """a_f, a_b: (..., 4H) in PyTorch gate order (i, f, g, o).
    Returns (..., 8H) fused blocks [i_f i_b | f_f f_b | o_f o_b | g_f g_b]."""
    parts = []
    for k in _GATE_ORDER:
        parts.append(a_f[..., k * H:(k + 1) * H])
        parts.append(a_b[..., k * H:(k + 1) * H])
    return jnp.concatenate(parts, axis=-1)


def layer0_wih(wih_f, wih_b, H):
    """(E,4H) fwd/bwd input weights -> (2E,8H): rows 0:E consume emb(t) (fwd-gate cols),
    rows E:2E consume emb(T-1-t) (bwd-gate cols)."""
    zf = jnp.zeros_like(wih_f)
    zb = jnp.zeros_like(wih_b)
    return jnp.concatenate([fuse_gates(wih_f, zf, H),
                            fuse_gates(zb, wih_b, H)], axis=0)


def layerN_wih(wih_f, wih_b, H):
    """(2H,4H) fwd/bwd input weights of layer>=1 -> (4H,8H) acting on the stacked
    per-iteration input [h_fwd(s) | h_bwd(T-1-s) | h_fwd(T-1-s) | h_bwd(s)]
    (the fwd/bwd time reversal is absorbed here as a row permutation)."""
    z = jnp.zeros((H, 4 * H), wih_f.dtype)
    r0 = fuse_gates(wih_f[0:H], z, H)          # h_fwd(s)      -> fwd gates
    r1 = fuse_gates(z, wih_b[H:2 * H], H)      # h_bwd(T-1-s)  -> bwd gates
    r2 = fuse_gates(z, wih_b[0:H], H)          # h_fwd(T-1-s)  -> bwd gates
    r3 = fuse_gates(wih_f[H:2 * H], z, H)      # h_bwd(s)      -> fwd gates
    return jnp.concatenate([r0, r1, r2, r3], axis=0)


def fused_whh(whh_f, whh_b, H):
    """(H,4H) fwd/bwd recurrence weights -> (2H,8H) block-diagonal so that
    [h_fwd | h_bwd] @ W gives both directions' gate pre-activations in one matmul."""
    z = jnp.zeros_like(whh_f)
    return jnp.concatenate([fuse_gates(whh_f, z, H),
                            fuse_gates(z, whh_b, H)], axis=0)


def _slab_offsets(E, H, L):
    """Static row layout of the packed weight slab (shared by weight prep and kernel)."""
    offs = {}
    r = 0
    offs[("wih", 0)] = (r, 2 * E); r += 2 * E
    for l in range(1, L):
        offs[("wih", l)] = (r, 4 * H); r += 4 * H
    for l in range(L):
        offs[("whh", l)] = (r, 2 * H); r += 2 * H
    offs["fc"] = (r, L * 2 * H); r += L * 2 * H
    return offs, r


# --------------------------- fused TextRNN kernel ----------------------------
def fused_textrnn_kernel(x0_ref, w_ref, b_ref, out_ref, *, E, H, L, T, B, O):
    """x0_ref : (T*B, 2E) bf16 -- rows s*B:(s+1)*B hold [emb(s) | emb(T-1-s)]
       w_ref  : (R, 8H)   bf16 -- packed weight slab (layout = _slab_offsets)
       b_ref  : (L+1, 8H) f32  -- rows 0..L-1 fused LSTM biases, row L = fc bias (padded)
       out_ref: (B, O)    f32  -- log-probabilities
    """
    H2 = 2 * H
    offs, _ = _slab_offsets(E, H, L)
    b_all = b_ref[...]                                        # (L+1, 8H) f32

    def run_layer(xz, whh):
        # xz : (T*B, 8H) f32 precomputed x-projection (+bias) for every iteration.
        # whh: (2H, 8H) bf16 fused recurrence weight, read ONCE and reused for all T steps.
        h = jnp.zeros((B, H2), jnp.float32)                   # [h_fwd | h_bwd]
        c = jnp.zeros((B, H2), jnp.float32)                   # [c_fwd | c_bwd]
        hs = []
        for s in range(T):
            z = xz[s * B:(s + 1) * B, :] + jnp.dot(
                h.astype(jnp.bfloat16), whh, preferred_element_type=jnp.float32)
            sig = jax.nn.sigmoid(z[:, 0:3 * H2])              # [i | f | o] in one shot
            i_g = sig[:, 0 * H2:1 * H2]
            f_g = sig[:, 1 * H2:2 * H2]
            o_g = sig[:, 2 * H2:3 * H2]
            g_g = jnp.tanh(z[:, 3 * H2:4 * H2])
            c = f_g * c + i_g * g_g
            h = o_g * jnp.tanh(c)
            hs.append(h)
        # final h: fwd half just processed t=T-1, bwd half just processed t=0
        return h, hs

    h_finals = []
    hs = None
    for l in range(L):
        r0, n = offs[("wih", l)]
        wih = w_ref[r0:r0 + n, :]                             # (2E or 4H, 8H) bf16
        r0, n = offs[("whh", l)]
        whh = w_ref[r0:r0 + n, :]                             # (2H, 8H) bf16
        bias = b_all[l:l + 1, :]                              # (1, 8H) f32

        if l == 0:
            x_in = x0_ref[...]                                # (T*B, 2E) bf16
        else:
            # Stack the previous layer's T step outputs into one slab so the whole
            # layer-l input projection is ONE matmul, hoisted out of the recurrence.
            # hs[s] = [h_fwd(time s) | h_bwd(time T-1-s)].
            x_in = jnp.concatenate(
                [jnp.concatenate([hs[s], hs[T - 1 - s]], axis=-1) for s in range(T)],
                axis=0).astype(jnp.bfloat16)                  # (T*B, 4H)

        xz = jnp.dot(x_in, wih, preferred_element_type=jnp.float32) + bias   # (T*B, 8H)
        h_fin, hs = run_layer(xz, whh)
        h_finals.append(h_fin)

    # Epilogue: FC + log-softmax.  Feature order matches torch.cat over h_n:
    # l0_fwd, l0_bwd, l1_fwd, l1_bwd, ...  (each h_finals[l] is [h_fwd | h_bwd]).
    feat = jnp.concatenate(h_finals, axis=-1).astype(jnp.bfloat16)            # (B, L*2H)
    r0, n = offs["fc"]
    fcw = w_ref[r0:r0 + n, :]                                 # (L*2H, 8H), cols >= O are zero
    fcb = b_all[L:L + 1, 0:O]                                 # (1, O)
    logits = jnp.dot(feat, fcw, preferred_element_type=jnp.float32)[:, 0:O] + fcb
    m = jnp.max(logits, axis=-1, keepdims=True)
    sh = logits - m
    lse = jnp.log(jnp.sum(jnp.exp(sh), axis=-1, keepdims=True))
    out_ref[...] = sh - lse


# ------------------------------ model glue -----------------------------------
def init_params(key, cfg, vocab_size):
    """Raw per-direction parameters (same structure as the PyTorch module)."""
    E, H, L = cfg.embed_size, cfg.hidden_size, cfg.hidden_layers
    ndir = 2 if cfg.bidirectional else 1
    keys = jax.random.split(key, 1 + 3 * L * ndir + 2)
    ki = iter(keys)

    params = {"embedding": jax.random.normal(next(ki), (vocab_size, E), jnp.float32) * 0.1}
    lstm = {}
    for l in range(L):
        din = E if l == 0 else H * ndir
        for d in range(ndir):
            w_ih = jax.random.normal(next(ki), (din, 4 * H), jnp.float32) * 0.1
            w_hh = jax.random.normal(next(ki), (H, 4 * H), jnp.float32) * 0.1
            b = jax.random.normal(next(ki), (1, 4 * H), jnp.float32) * 0.1  # b_ih + b_hh combined
            lstm[(l, d)] = (w_ih, w_hh, b)
    params["lstm"] = lstm

    F = H * L * ndir
    params["fc_w"] = jax.random.normal(next(ki), (F, cfg.output_size), jnp.float32) * 0.1
    params["fc_b"] = jax.random.normal(next(ki), (1, cfg.output_size), jnp.float32) * 0.1
    return params


def prepare_kernel_params(params, cfg):
    """One-time permutation/packing of the raw weights into two lane-dense kernel slabs."""
    assert cfg.bidirectional, "fused kernel assumes a bidirectional LSTM"
    E, H, L, O = cfg.embed_size, cfg.hidden_size, cfg.hidden_layers, cfg.output_size
    _, total_rows = _slab_offsets(E, H, L)

    w_rows, b_rows = [], []
    for l in range(L):
        wih_f, _, b_f = params["lstm"][(l, 0)]
        wih_b, _, b_b = params["lstm"][(l, 1)]
        w_rows.append(layer0_wih(wih_f, wih_b, H) if l == 0 else layerN_wih(wih_f, wih_b, H))
        b_rows.append(fuse_gates(b_f, b_b, H))                               # (1, 8H)
    for l in range(L):
        _, whh_f, _ = params["lstm"][(l, 0)]
        _, whh_b, _ = params["lstm"][(l, 1)]
        w_rows.append(fused_whh(whh_f, whh_b, H))
    w_rows.append(jnp.concatenate(
        [params["fc_w"], jnp.zeros((L * 2 * H, 8 * H - O), jnp.float32)], axis=-1))
    b_rows.append(jnp.concatenate(
        [params["fc_b"], jnp.zeros((1, 8 * H - O), jnp.float32)], axis=-1))

    w_slab = jnp.concatenate(w_rows, axis=0).astype(jnp.bfloat16)            # (R, 8H)
    assert w_slab.shape[0] == total_rows
    b_slab = jnp.concatenate(b_rows, axis=0)                                 # (L+1, 8H) f32
    return {"embedding": params["embedding"], "w_slab": w_slab, "b_slab": b_slab}


def textrnn_forward(kp, x_ids, cfg):
    """x_ids: (T, B) int32 token ids.  Returns (B, output_size) log-probs."""
    E, H, L, O = cfg.embed_size, cfg.hidden_size, cfg.hidden_layers, cfg.output_size
    T, B = x_ids.shape

    emb = jnp.take(kp["embedding"], x_ids, axis=0)                 # (T, B, E)
    # The gate-interleave permutation and the bwd time reversal are folded into the
    # weight slab; the wrapper only presents [emb(t) | emb(T-1-t)] per iteration.
    x0 = jnp.concatenate([emb, emb[::-1]], axis=-1)                # (T, B, 2E)
    x0 = x0.reshape(T * B, 2 * E).astype(jnp.bfloat16)

    kernel = functools.partial(fused_textrnn_kernel, E=E, H=H, L=L, T=T, B=B, O=O)
    return pl.pallas_call(
        kernel,
        out_shape=jax.ShapeDtypeStruct((B, O), jnp.float32),
        in_specs=[pl.BlockSpec(memory_space=pltpu.MemorySpace.VMEM)] * 3,
        out_specs=pl.BlockSpec(memory_space=pltpu.MemorySpace.VMEM),
    )(x0, kp["w_slab"], kp["b_slab"])


# ------------------------- pure-JAX reference --------------------------------
def _ref_lstm_dir(x_seq, w_ih, w_hh, b, reverse):
    T, B, _ = x_seq.shape
    H = w_hh.shape[0]
    h = jnp.zeros((B, H), jnp.float32)
    c = jnp.zeros((B, H), jnp.float32)
    order = range(T - 1, -1, -1) if reverse else range(T)
    outs = [None] * T
    for t in order:
        z = x_seq[t] @ w_ih + h @ w_hh + b
        i = jax.nn.sigmoid(z[:, 0 * H:1 * H])
        f = jax.nn.sigmoid(z[:, 1 * H:2 * H])
        g = jnp.tanh(z[:, 2 * H:3 * H])
        o = jax.nn.sigmoid(z[:, 3 * H:4 * H])
        c = f * c + i * g
        h = o * jnp.tanh(c)
        outs[t] = h
    return jnp.stack(outs, axis=0), h


def textrnn_ref(params, x_ids, cfg):
    ndir = 2 if cfg.bidirectional else 1
    emb = jnp.take(params["embedding"], x_ids, axis=0)
    layer_input = emb
    h_finals = []
    for l in range(cfg.hidden_layers):
        dir_outs = []
        for d in range(ndir):
            w_ih, w_hh, b = params["lstm"][(l, d)]
            out_seq, h_n = _ref_lstm_dir(layer_input, w_ih, w_hh, b, reverse=(d == 1))
            dir_outs.append(out_seq)
            h_finals.append(h_n)
        layer_input = jnp.concatenate(dir_outs, axis=-1)
    feat = jnp.concatenate(h_finals, axis=-1)
    logits = feat @ params["fc_w"] + params["fc_b"]
    return jax.nn.log_softmax(logits, axis=-1)


# ------------------------------- main ----------------------------------------
if __name__ == "__main__":
    cfg = Config()
    key = jax.random.PRNGKey(0)
    k_params, k_x = jax.random.split(key)

    params = init_params(k_params, cfg, VOCAB_SIZE)
    x_ids = jax.random.randint(k_x, (SEQ_LEN, BATCH), 0, VOCAB_SIZE, dtype=jnp.int32)

    kparams = prepare_kernel_params(params, cfg)
    fwd = jax.jit(functools.partial(textrnn_forward, cfg=cfg))
    out = jax.block_until_ready(fwd(kparams, x_ids))

    ref = textrnn_ref(params, x_ids, cfg)
    assert out.shape == (BATCH, cfg.output_size)
    # bf16 matmul operands -> tolerance loosened vs. the pure-f32 reference.
    assert jnp.allclose(out, ref, atol=2e-2, rtol=2e-2), (out, ref)

    print("KERNEL_OK")
</pallas_src>

<mosaic_0001>
module attributes {stable_mosaic.version = 11 : i64} {
  func.func @fused_textrnn_kernel(%arg0: memref<16x64xbf16, #tpu.memory_space<vmem>>, %arg1: memref<448x256xbf16, #tpu.memory_space<vmem>>, %arg2: memref<3x256xf32, #tpu.memory_space<vmem>>, %arg3: memref<2x4xf32, #tpu.memory_space<vmem>>) attributes {dimension_semantics = [], scalar_prefetch = 0 : i64, scratch_operands = 0 : i64, tpu.core_type = #tpu.core_type<tc>} {
    %c0 = arith.constant 0 : index
    %c0_0 = arith.constant 0 : index
    %0 = vector.load %arg2[%c0, %c0_0] : memref<3x256xf32, #tpu.memory_space<vmem>>, vector<3x256xf32>
    %c0_1 = arith.constant 0 : index
    %c0_2 = arith.constant 0 : index
    %1 = vector.load %arg1[%c0_1, %c0_2] : memref<448x256xbf16, #tpu.memory_space<vmem>>, vector<64x256xbf16>
    %c192 = arith.constant 192 : index
    %c0_3 = arith.constant 0 : index
    %2 = vector.load %arg1[%c192, %c0_3] : memref<448x256xbf16, #tpu.memory_space<vmem>>, vector<64x256xbf16>
    %3 = vector.extract_strided_slice %0 {offsets = [0, 0], sizes = [1, 256], strides = [1, 1]} : vector<3x256xf32> to vector<1x256xf32>
    %c0_4 = arith.constant 0 : index
    %c0_5 = arith.constant 0 : index
    %4 = vector.load %arg0[%c0_4, %c0_5] : memref<16x64xbf16, #tpu.memory_space<vmem>>, vector<16x64xbf16>
    %cst = arith.constant dense<0.000000e+00> : vector<16x256xf32>
    %5 = tpu.matmul %4, %1, %cst {dimension_numbers = #tpu.dot_dimension_numbers<[1], [0], [0], [1], [0, 0, 1, 1], [], []>} : vector<16x64xbf16>, vector<64x256xbf16>, vector<16x256xf32> -> vector<16x256xf32>
    %6 = vector.broadcast %3 : vector<1x256xf32> to vector<16x256xf32>
    %7 = arith.addf %5, %6 : vector<16x256xf32>
    %cst_6 = arith.constant 0.000000e+00 : f32
    %8 = vector.broadcast %cst_6 : f32 to vector<2x64xf32>
    %cst_7 = arith.constant 0.000000e+00 : f32
    %9 = vector.broadcast %cst_7 : f32 to vector<2x64xf32>
    %10 = vector.extract_strided_slice %7 {offsets = [0, 0], sizes = [2, 256], strides = [1, 1]} : vector<16x256xf32> to vector<2x256xf32>
    %11 = arith.truncf %8 : vector<2x64xf32> to vector<2x64xbf16>
    %cst_8 = arith.constant dense<0.000000e+00> : vector<2x256xf32>
    %12 = tpu.matmul %11, %2, %cst_8 {dimension_numbers = #tpu.dot_dimension_numbers<[1], [0], [0], [1], [0, 0, 1, 1], [], []>} : vector<2x64xbf16>, vector<64x256xbf16>, vector<2x256xf32> -> vector<2x256xf32>
    %13 = arith.addf %10, %12 : vector<2x256xf32>
    %14 = vector.extract_strided_slice %13 {offsets = [0, 0], sizes = [2, 192], strides = [1, 1]} : vector<2x256xf32> to vector<2x192xf32>
    %15 = arith.negf %14 : vector<2x192xf32>
    %16 = math.exp %15 : vector<2x192xf32>
    %cst_9 = arith.constant 1.000000e+00 : f32
    %17 = vector.broadcast %cst_9 : f32 to vector<2x192xf32>
    %18 = arith.addf %17, %16 : vector<2x192xf32>
    %19 = arith.divf %17, %18 : vector<2x192xf32>
    %20 = vector.extract_strided_slice %19 {offsets = [0, 0], sizes = [2, 64], strides = [1, 1]} : vector<2x192xf32> to vector<2x64xf32>
    %21 = vector.extract_strided_slice %19 {offsets = [0, 64], sizes = [2, 64], strides = [1, 1]} : vector<2x192xf32> to vector<2x64xf32>
    %22 = vector.extract_strided_slice %19 {offsets = [0, 128], sizes = [2, 64], strides = [1, 1]} : vector<2x192xf32> to vector<2x64xf32>
    %23 = vector.extract_strided_slice %13 {offsets = [0, 192], sizes = [2, 64], strides = [1, 1]} : vector<2x256xf32> to vector<2x64xf32>
    %24 = math.tanh %23 : vector<2x64xf32>
    %25 = arith.mulf %21, %9 : vector<2x64xf32>
    %26 = arith.mulf %20, %24 : vector<2x64xf32>
    %27 = arith.addf %25, %26 : vector<2x64xf32>
    %28 = math.tanh %27 : vector<2x64xf32>
    %29 = arith.mulf %22, %28 : vector<2x64xf32>
    %30 = vector.extract_strided_slice %7 {offsets = [2, 0], sizes = [2, 256], strides = [1, 1]} : vector<16x256xf32> to vector<2x256xf32>
    %31 = arith.truncf %29 : vector<2x64xf32> to vector<2x64xbf16>
    %cst_10 = arith.constant dense<0.000000e+00> : vector<2x256xf32>
    %32 = tpu.matmul %31, %2, %cst_10 {dimension_numbers = #tpu.dot_dimension_numbers<[1], [0], [0], [1], [0, 0, 1, 1], [], []>} : vector<2x64xbf16>, vector<64x256xbf16>, vector<2x256xf32> -> vector<2x256xf32>
    %33 = arith.addf %30, %32 : vector<2x256xf32>
    %34 = vector.extract_strided_slice %33 {offsets = [0, 0], sizes = [2, 192], strides = [1, 1]} : vector<2x256xf32> to vector<2x192xf32>
    %35 = arith.negf %34 : vector<2x192xf32>
    %36 = math.exp %35 : vector<2x192xf32>
    %cst_11 = arith.constant 1.000000e+00 : f32
    %37 = vector.broadcast %cst_11 : f32 to vector<2x192xf32>
    %38 = arith.addf %37, %36 : vector<2x192xf32>
    %39 = arith.divf %37, %38 : vector<2x192xf32>
    %40 = vector.extract_strided_slice %39 {offsets = [0, 0], sizes = [2, 64], strides = [1, 1]} : vector<2x192xf32> to vector<2x64xf32>
    %41 = vector.extract_strided_slice %39 {offsets = [0, 64], sizes = [2, 64], strides = [1, 1]} : vector<2x192xf32> to vector<2x64xf32>
    %42 = vector.extract_strided_slice %39 {offsets = [0, 128], sizes = [2, 64], strides = [1, 1]} : vector<2x192xf32> to vector<2x64xf32>
    %43 = vector.extract_strided_slice %33 {offsets = [0, 192], sizes = [2, 64], strides = [1, 1]} : vector<2x256xf32> to vector<2x64xf32>
    %44 = math.tanh %43 : vector<2x64xf32>
    %45 = arith.mulf %41, %27 : vector<2x64xf32>
    %46 = arith.mulf %40, %44 : vector<2x64xf32>
    %47 = arith.addf %45, %46 : vector<2x64xf32>
    %48 = math.tanh %47 : vector<2x64xf32>
    %49 = arith.mulf %42, %48 : vector<2x64xf32>
    %50 = vector.extract_strided_slice %7 {offsets = [4, 0], sizes = [2, 256], strides = [1, 1]} : vector<16x256xf32> to vector<2x256xf32>
    %51 = arith.truncf %49 : vector<2x64xf32> to vector<2x64xbf16>
    %cst_12 = arith.constant dense<0.000000e+00> : vector<2x256xf32>
    %52 = tpu.matmul %51, %2, %cst_12 {dimension_numbers = #tpu.dot_dimension_numbers<[1], [0], [0], [1], [0, 0, 1, 1], [], []>} : vector<2x64xbf16>, vector<64x256xbf16>, vector<2x256xf32> -> vector<2x256xf32>
    %53 = arith.addf %50, %52 : vector<2x256xf32>
    %54 = vector.extract_strided_slice %53 {offsets = [0, 0], sizes = [2, 192], strides = [1, 1]} : vector<2x256xf32> to vector<2x192xf32>
    %55 = arith.negf %54 : vector<2x192xf32>
    %56 = math.exp %55 : vector<2x192xf32>
    %cst_13 = arith.constant 1.000000e+00 : f32
    %57 = vector.broadcast %cst_13 : f32 to vector<2x192xf32>
    %58 = arith.addf %57, %56 : vector<2x192xf32>
    %59 = arith.divf %57, %58 : vector<2x192xf32>
    %60 = vector.extract_strided_slice %59 {offsets = [0, 0], sizes = [2, 64], strides = [1, 1]} : vector<2x192xf32> to vector<2x64xf32>
    %61 = vector.extract_strided_slice %59 {offsets = [0, 64], sizes = [2, 64], strides = [1, 1]} : vector<2x192xf32> to vector<2x64xf32>
    %62 = vector.extract_strided_slice %59 {offsets = [0, 128], sizes = [2, 64], strides = [1, 1]} : vector<2x192xf32> to vector<2x64xf32>
    %63 = vector.extract_strided_slice %53 {offsets = [0, 192], sizes = [2, 64], strides = [1, 1]} : vector<2x256xf32> to vector<2x64xf32>
    %64 = math.tanh %63 : vector<2x64xf32>
    %65 = arith.mulf %61, %47 : vector<2x64xf32>
    %66 = arith.mulf %60, %64 : vector<2x64xf32>
    %67 = arith.addf %65, %66 : vector<2x64xf32>
    %68 = math.tanh %67 : vector<2x64xf32>
    %69 = arith.mulf %62, %68 : vector<2x64xf32>
    %70 = vector.extract_strided_slice %7 {offsets = [6, 0], sizes = [2, 256], strides = [1, 1]} : vector<16x256xf32> to vector<2x256xf32>
    %71 = arith.truncf %69 : vector<2x64xf32> to vector<2x64xbf16>
    %cst_14 = arith.constant dense<0.000000e+00> : vector<2x256xf32>
    %72 = tpu.matmul %71, %2, %cst_14 {dimension_numbers = #tpu.dot_dimension_numbers<[1], [0], [0], [1], [0, 0, 1, 1], [], []>} : vector<2x64xbf16>, vector<64x256xbf16>, vector<2x256xf32> -> vector<2x256xf32>
    %73 = arith.addf %70, %72 : vector<2x256xf32>
    %74 = vector.extract_strided_slice %73 {offsets = [0, 0], sizes = [2, 192], strides = [1, 1]} : vector<2x256xf32> to vector<2x192xf32>
    %75 = arith.negf %74 : vector<2x192xf32>
    %76 = math.exp %75 : vector<2x192xf32>
    %cst_15 = arith.constant 1.000000e+00 : f32
    %77 = vector.broadcast %cst_15 : f32 to vector<2x192xf32>
    %78 = arith.addf %77, %76 : vector<2x192xf32>
    %79 = arith.divf %77, %78 : vector<2x192xf32>
    %80 = vector.extract_strided_slice %79 {offsets = [0, 0], sizes = [2, 64], strides = [1, 1]} : vector<2x192xf32> to vector<2x64xf32>
    %81 = vector.extract_strided_slice %79 {offsets = [0, 64], sizes = [2, 64], strides = [1, 1]} : vector<2x192xf32> to vector<2x64xf32>
    %82 = vector.extract_strided_slice %79 {offsets = [0, 128], sizes = [2, 64], strides = [1, 1]} : vector<2x192xf32> to vector<2x64xf32>
    %83 = vector.extract_strided_slice %73 {offsets = [0, 192], sizes = [2, 64], strides = [1, 1]} : vector<2x256xf32> to vector<2x64xf32>
    %84 = math.tanh %83 : vector<2x64xf32>
    %85 = arith.mulf %81, %67 : vector<2x64xf32>
    %86 = arith.mulf %80, %84 : vector<2x64xf32>
    %87 = arith.addf %85, %86 : vector<2x64xf32>
    %88 = math.tanh %87 : vector<2x64xf32>
    %89 = arith.mulf %82, %88 : vector<2x64xf32>
    %90 = vector.extract_strided_slice %7 {offsets = [8, 0], sizes = [2, 256], strides = [1, 1]} : vector<16x256xf32> to vector<2x256xf32>
    %91 = arith.truncf %89 : vector<2x64xf32> to vector<2x64xbf16>
    %cst_16 = arith.constant dense<0.000000e+00> : vector<2x256xf32>
    %92 = tpu.matmul %91, %2, %cst_16 {dimension_numbers = #tpu.dot_dimension_numbers<[1], [0], [0], [1], [0, 0, 1, 1], [], []>} : vector<2x64xbf16>, vector<64x256xbf16>, vector<2x256xf32> -> vector<2x256xf32>
    %93 = arith.addf %90, %92 : vector<2x256xf32>
    %94 = vector.extract_strided_slice %93 {offsets = [0, 0], sizes = [2, 192], strides = [1, 1]} : vector<2x256xf32> to vector<2x192xf32>
    %95 = arith.negf %94 : vector<2x192xf32>
    %96 = math.exp %95 : vector<2x192xf32>
    %cst_17 = arith.constant 1.000000e+00 : f32
    %97 = vector.broadcast %cst_17 : f32 to vector<2x192xf32>
    %98 = arith.addf %97, %96 : vector<2x192xf32>
    %99 = arith.divf %97, %98 : vector<2x192xf32>
    %100 = vector.extract_strided_slice %99 {offsets = [0, 0], sizes = [2, 64], strides = [1, 1]} : vector<2x192xf32> to vector<2x64xf32>
    %101 = vector.extract_strided_slice %99 {offsets = [0, 64], sizes = [2, 64], strides = [1, 1]} : vector<2x192xf32> to vector<2x64xf32>
    %102 = vector.extract_strided_slice %99 {offsets = [0, 128], sizes = [2, 64], strides = [1, 1]} : vector<2x192xf32> to vector<2x64xf32>
    %103 = vector.extract_strided_slice %93 {offsets = [0, 192], sizes = [2, 64], strides = [1, 1]} : vector<2x256xf32> to vector<2x64xf32>
    %104 = math.tanh %103 : vector<2x64xf32>
    %105 = arith.mulf %101, %87 : vector<2x64xf32>
    %106 = arith.mulf %100, %104 : vector<2x64xf32>
    %107 = arith.addf %105, %106 : vector<2x64xf32>
    %108 = math.tanh %107 : vector<2x64xf32>
    %109 = arith.mulf %102, %108 : vector<2x64xf32>
    %110 = vector.extract_strided_slice %7 {offsets = [10, 0], sizes = [2, 256], strides = [1, 1]} : vector<16x256xf32> to vector<2x256xf32>
    %111 = arith.truncf %109 : vector<2x64xf32> to vector<2x64xbf16>
    %cst_18 = arith.constant dense<0.000000e+00> : vector<2x256xf32>
    %112 = tpu.matmul %111, %2, %cst_18 {dimension_numbers = #tpu.dot_dimension_numbers<[1], [0], [0], [1], [0, 0, 1, 1], [], []>} : vector<2x64xbf16>, vector<64x256xbf16>, vector<2x256xf32> -> vector<2x256xf32>
    %113 = arith.addf %110, %112 : vector<2x256xf32>
    %114 = vector.extract_strided_slice %113 {offsets = [0, 0], sizes = [2, 192], strides = [1, 1]} : vector<2x256xf32> to vector<2x192xf32>
    %115 = arith.negf %114 : vector<2x192xf32>
    %116 = math.exp %115 : vector<2x192xf32>
    %cst_19 = arith.constant 1.000000e+00 : f32
    %117 = vector.broadcast %cst_19 : f32 to vector<2x192xf32>
    %118 = arith.addf %117, %116 : vector<2x192xf32>
    %119 = arith.divf %117, %118 : vector<2x192xf32>
    %120 = vector.extract_strided_slice %119 {offsets = [0, 0], sizes = [2, 64], strides = [1, 1]} : vector<2x192xf32> to vector<2x64xf32>
    %121 = vector.extract_strided_slice %119 {offsets = [0, 64], sizes = [2, 64], strides = [1, 1]} : vector<2x192xf32> to vector<2x64xf32>
    %122 = vector.extract_strided_slice %119 {offsets = [0, 128], sizes = [2, 64], strides = [1, 1]} : vector<2x192xf32> to vector<2x64xf32>
    %123 = vector.extract_strided_slice %113 {offsets = [0, 192], sizes = [2, 64], strides = [1, 1]} : vector<2x256xf32> to vector<2x64xf32>
    %124 = math.tanh %123 : vector<2x64xf32>
    %125 = arith.mulf %121, %107 : vector<2x64xf32>
    %126 = arith.mulf %120, %124 : vector<2x64xf32>
    %127 = arith.addf %125, %126 : vector<2x64xf32>
    %128 = math.tanh %127 : vector<2x64xf32>
    %129 = arith.mulf %122, %128 : vector<2x64xf32>
    %130 = vector.extract_strided_slice %7 {offsets = [12, 0], sizes = [2, 256], strides = [1, 1]} : vector<16x256xf32> to vector<2x256xf32>
    %131 = arith.truncf %129 : vector<2x64xf32> to vector<2x64xbf16>
    %cst_20 = arith.constant dense<0.000000e+00> : vector<2x256xf32>
    %132 = tpu.matmul %131, %2, %cst_20 {dimension_numbers = #tpu.dot_dimension_numbers<[1], [0], [0], [1], [0, 0, 1, 1], [], []>} : vector<2x64xbf16>, vector<64x256xbf16>, vector<2x256xf32> -> vector<2x256xf32>
    %133 = arith.addf %130, %132 : vector<2x256xf32>
    %134 = vector.extract_strided_slice %133 {offsets = [0, 0], sizes = [2, 192], strides = [1, 1]} : vector<2x256xf32> to vector<2x192xf32>
    %135 = arith.negf %134 : vector<2x192xf32>
    %136 = math.exp %135 : vector<2x192xf32>
    %cst_21 = arith.constant 1.000000e+00 : f32
    %137 = vector.broadcast %cst_21 : f32 to vector<2x192xf32>
    %138 = arith.addf %137, %136 : vector<2x192xf32>
    %139 = arith.divf %137, %138 : vector<2x192xf32>
    %140 = vector.extract_strided_slice %139 {offsets = [0, 0], sizes = [2, 64], strides = [1, 1]} : vector<2x192xf32> to vector<2x64xf32>
    %141 = vector.extract_strided_slice %139 {offsets = [0, 64], sizes = [2, 64], strides = [1, 1]} : vector<2x192xf32> to vector<2x64xf32>
    %142 = vector.extract_strided_slice %139 {offsets = [0, 128], sizes = [2, 64], strides = [1, 1]} : vector<2x192xf32> to vector<2x64xf32>
    %143 = vector.extract_strided_slice %133 {offsets = [0, 192], sizes = [2, 64], strides = [1, 1]} : vector<2x256xf32> to vector<2x64xf32>
    %144 = math.tanh %143 : vector<2x64xf32>
    %145 = arith.mulf %141, %127 : vector<2x64xf32>
    %146 = arith.mulf %140, %144 : vector<2x64xf32>
    %147 = arith.addf %145, %146 : vector<2x64xf32>
    %148 = math.tanh %147 : vector<2x64xf32>
    %149 = arith.mulf %142, %148 : vector<2x64xf32>
    %150 = vector.extract_strided_slice %7 {offsets = [14, 0], sizes = [2, 256], strides = [1, 1]} : vector<16x256xf32> to vector<2x256xf32>
    %151 = arith.truncf %149 : vector<2x64xf32> to vector<2x64xbf16>
    %cst_22 = arith.constant dense<0.000000e+00> : vector<2x256xf32>
    %152 = tpu.matmul %151, %2, %cst_22 {dimension_numbers = #tpu.dot_dimension_numbers<[1], [0], [0], [1], [0, 0, 1, 1], [], []>} : vector<2x64xbf16>, vector<64x256xbf16>, vector<2x256xf32> -> vector<2x256xf32>
    %153 = arith.addf %150, %152 : vector<2x256xf32>
    %154 = vector.extract_strided_slice %153 {offsets = [0, 0], sizes = [2, 192], strides = [1, 1]} : vector<2x256xf32> to vector<2x192xf32>
    %155 = arith.negf %154 : vector<2x192xf32>
    %156 = math.exp %155 : vector<2x192xf32>
    %cst_23 = arith.constant 1.000000e+00 : f32
    %157 = vector.broadcast %cst_23 : f32 to vector<2x192xf32>
    %158 = arith.addf %157, %156 : vector<2x192xf32>
    %159 = arith.divf %157, %158 : vector<2x192xf32>
    %160 = vector.extract_strided_slice %159 {offsets = [0, 0], sizes = [2, 64], strides = [1, 1]} : vector<2x192xf32> to vector<2x64xf32>
    %161 = vector.extract_strided_slice %159 {offsets = [0, 64], sizes = [2, 64], strides = [1, 1]} : vector<2x192xf32> to vector<2x64xf32>
    %162 = vector.extract_strided_slice %159 {offsets = [0, 128], sizes = [2, 64], strides = [1, 1]} : vector<2x192xf32> to vector<2x64xf32>
    %163 = vector.extract_strided_slice %153 {offsets = [0, 192], sizes = [2, 64], strides = [1, 1]} : vector<2x256xf32> to vector<2x64xf32>
    %164 = math.tanh %163 : vector<2x64xf32>
    %165 = arith.mulf %161, %147 : vector<2x64xf32>
    %166 = arith.mulf %160, %164 : vector<2x64xf32>
    %167 = arith.addf %165, %166 : vector<2x64xf32>
    %168 = math.tanh %167 : vector<2x64xf32>
    %169 = arith.mulf %162, %168 : vector<2x64xf32>
    %c64 = arith.constant 64 : index
    %c0_24 = arith.constant 0 : index
    %170 = vector.load %arg1[%c64, %c0_24] : memref<448x256xbf16, #tpu.memory_space<vmem>>, vector<128x256xbf16>
    %c256 = arith.constant 256 : index
    %c0_25 = arith.constant 0 : index
    %171 = vector.load %arg1[%c256, %c0_25] : memref<448x256xbf16, #tpu.memory_space<vmem>>, vector<64x256xbf16>
    %172 = vector.extract_strided_slice %0 {offsets = [1, 0], sizes = [1, 256], strides = [1, 1]} : vector<3x256xf32> to vector<1x256xf32>
    %173 = tpu.concatenate %29, %169 in 1 : vector<2x64xf32>, vector<2x64xf32> -> vector<2x128xf32>
    %174 = tpu.concatenate %49, %149 in 1 : vector<2x64xf32>, vector<2x64xf32> -> vector<2x128xf32>
    %175 = tpu.concatenate %69, %129 in 1 : vector<2x64xf32>, vector<2x64xf32> -> vector<2x128xf32>
    %176 = tpu.concatenate %89, %109 in 1 : vector<2x64xf32>, vector<2x64xf32> -> vector<2x128xf32>
    %177 = tpu.concatenate %109, %89 in 1 : vector<2x64xf32>, vector<2x64xf32> -> vector<2x128xf32>
    %178 = tpu.concatenate %129, %69 in 1 : vector<2x64xf32>, vector<2x64xf32> -> vector<2x128xf32>
    %179 = tpu.concatenate %149, %49 in 1 : vector<2x64xf32>, vector<2x64xf32> -> vector<2x128xf32>
    %180 = tpu.concatenate %169, %29 in 1 : vector<2x64xf32>, vector<2x64xf32> -> vector<2x128xf32>
    %181 = tpu.concatenate %173, %174, %175, %176, %177, %178, %179, %180 in 0 : vector<2x128xf32>, vector<2x128xf32>, vector<2x128xf32>, vector<2x128xf32>, vector<2x128xf32>, vector<2x128xf32>, vector<2x128xf32>, vector<2x128xf32> -> vector<16x128xf32>
    %182 = arith.truncf %181 : vector<16x128xf32> to vector<16x128xbf16>
    %cst_26 = arith.constant dense<0.000000e+00> : vector<16x256xf32>
    %183 = tpu.matmul %182, %170, %cst_26 {dimension_numbers = #tpu.dot_dimension_numbers<[1], [0], [0], [1], [0, 0, 1, 1], [], []>} : vector<16x128xbf16>, vector<128x256xbf16>, vector<16x256xf32> -> vector<16x256xf32>
    %184 = vector.broadcast %172 : vector<1x256xf32> to vector<16x256xf32>
    %185 = arith.addf %183, %184 : vector<16x256xf32>
    %cst_27 = arith.constant 0.000000e+00 : f32
    %186 = vector.broadcast %cst_27 : f32 to vector<2x64xf32>
    %cst_28 = arith.constant 0.000000e+00 : f32
    %187 = vector.broadcast %cst_28 : f32 to vector<2x64xf32>
    %188 = vector.extract_strided_slice %185 {offsets = [0, 0], sizes = [2, 256], strides = [1, 1]} : vector<16x256xf32> to vector<2x256xf32>
    %189 = arith.truncf %186 : vector<2x64xf32> to vector<2x64xbf16>
    %cst_29 = arith.constant dense<0.000000e+00> : vector<2x256xf32>
    %190 = tpu.matmul %189, %171, %cst_29 {dimension_numbers = #tpu.dot_dimension_numbers<[1], [0], [0], [1], [0, 0, 1, 1], [], []>} : vector<2x64xbf16>, vector<64x256xbf16>, vector<2x256xf32> -> vector<2x256xf32>
    %191 = arith.addf %188, %190 : vector<2x256xf32>
    %192 = vector.extract_strided_slice %191 {offsets = [0, 0], sizes = [2, 192], strides = [1, 1]} : vector<2x256xf32> to vector<2x192xf32>
    %193 = arith.negf %192 : vector<2x192xf32>
    %194 = math.exp %193 : vector<2x192xf32>
    %cst_30 = arith.constant 1.000000e+00 : f32
    %195 = vector.broadcast %cst_30 : f32 to vector<2x192xf32>
    %196 = arith.addf %195, %194 : vector<2x192xf32>
    %197 = arith.divf %195, %196 : vector<2x192xf32>
    %198 = vector.extract_strided_slice %197 {offsets = [0, 0], sizes = [2, 64], strides = [1, 1]} : vector<2x192xf32> to vector<2x64xf32>
    %199 = vector.extract_strided_slice %197 {offsets = [0, 64], sizes = [2, 64], strides = [1, 1]} : vector<2x192xf32> to vector<2x64xf32>
    %200 = vector.extract_strided_slice %197 {offsets = [0, 128], sizes = [2, 64], strides = [1, 1]} : vector<2x192xf32> to vector<2x64xf32>
    %201 = vector.extract_strided_slice %191 {offsets = [0, 192], sizes = [2, 64], strides = [1, 1]} : vector<2x256xf32> to vector<2x64xf32>
    %202 = math.tanh %201 : vector<2x64xf32>
    %203 = arith.mulf %199, %187 : vector<2x64xf32>
    %204 = arith.mulf %198, %202 : vector<2x64xf32>
    %205 = arith.addf %203, %204 : vector<2x64xf32>
    %206 = math.tanh %205 : vector<2x64xf32>
    %207 = arith.mulf %200, %206 : vector<2x64xf32>
    %208 = vector.extract_strided_slice %185 {offsets = [2, 0], sizes = [2, 256], strides = [1, 1]} : vector<16x256xf32> to vector<2x256xf32>
    %209 = arith.truncf %207 : vector<2x64xf32> to vector<2x64xbf16>
    %cst_31 = arith.constant dense<0.000000e+00> : vector<2x256xf32>
    %210 = tpu.matmul %209, %171, %cst_31 {dimension_numbers = #tpu.dot_dimension_numbers<[1], [0], [0], [1], [0, 0, 1, 1], [], []>} : vector<2x64xbf16>, vector<64x256xbf16>, vector<2x256xf32> -> vector<2x256xf32>
    %211 = arith.addf %208, %210 : vector<2x256xf32>
    %212 = vector.extract_strided_slice %211 {offsets = [0, 0], sizes = [2, 192], strides = [1, 1]} : vector<2x256xf32> to vector<2x192xf32>
    %213 = arith.negf %212 : vector<2x192xf32>
    %214 = math.exp %213 : vector<2x192xf32>
    %cst_32 = arith.constant 1.000000e+00 : f32
    %215 = vector.broadcast %cst_32 : f32 to vector<2x192xf32>
    %216 = arith.addf %215, %214 : vector<2x192xf32>
    %217 = arith.divf %215, %216 : vector<2x192xf32>
    %218 = vector.extract_strided_slice %217 {offsets = [0, 0], sizes = [2, 64], strides = [1, 1]} : vector<2x192xf32> to vector<2x64xf32>
    %219 = vector.extract_strided_slice %217 {offsets = [0, 64], sizes = [2, 64], strides = [1, 1]} : vector<2x192xf32> to vector<2x64xf32>
    %220 = vector.extract_strided_slice %217 {offsets = [0, 128], sizes = [2, 64], strides = [1, 1]} : vector<2x192xf32> to vector<2x64xf32>
    %221 = vector.extract_strided_slice %211 {offsets = [0, 192], sizes = [2, 64], strides = [1, 1]} : vector<2x256xf32> to vector<2x64xf32>
    %222 = math.tanh %221 : vector<2x64xf32>
    %223 = arith.mulf %219, %205 : vector<2x64xf32>
    %224 = arith.mulf %218, %222 : vector<2x64xf32>
    %225 = arith.addf %223, %224 : vector<2x64xf32>
    %226 = math.tanh %225 : vector<2x64xf32>
    %227 = arith.mulf %220, %226 : vector<2x64xf32>
    %228 = vector.extract_strided_slice %185 {offsets = [4, 0], sizes = [2, 256], strides = [1, 1]} : vector<16x256xf32> to vector<2x256xf32>
    %229 = arith.truncf %227 : vector<2x64xf32> to vector<2x64xbf16>
    %cst_33 = arith.constant dense<0.000000e+00> : vector<2x256xf32>
    %230 = tpu.matmul %229, %171, %cst_33 {dimension_numbers = #tpu.dot_dimension_numbers<[1], [0], [0], [1], [0, 0, 1, 1], [], []>} : vector<2x64xbf16>, vector<64x256xbf16>, vector<2x256xf32> -> vector<2x256xf32>
    %231 = arith.addf %228, %230 : vector<2x256xf32>
    %232 = vector.extract_strided_slice %231 {offsets = [0, 0], sizes = [2, 192], strides = [1, 1]} : vector<2x256xf32> to vector<2x192xf32>
    %233 = arith.negf %232 : vector<2x192xf32>
    %234 = math.exp %233 : vector<2x192xf32>
    %cst_34 = arith.constant 1.000000e+00 : f32
    %235 = vector.broadcast %cst_34 : f32 to vector<2x192xf32>
    %236 = arith.addf %235, %234 : vector<2x192xf32>
    %237 = arith.divf %235, %236 : vector<2x192xf32>
    %238 = vector.extract_strided_slice %237 {offsets = [0, 0], sizes = [2, 64], strides = [1, 1]} : vector<2x192xf32> to vector<2x64xf32>
    %239 = vector.extract_strided_slice %237 {offsets = [0, 64], sizes = [2, 64], strides = [1, 1]} : vector<2x192xf32> to vector<2x64xf32>
    %240 = vector.extract_strided_slice %237 {offsets = [0, 128], sizes = [2, 64], strides = [1, 1]} : vector<2x192xf32> to vector<2x64xf32>
    %241 = vector.extract_strided_slice %231 {offsets = [0, 192], sizes = [2, 64], strides = [1, 1]} : vector<2x256xf32> to vector<2x64xf32>
    %242 = math.tanh %241 : vector<2x64xf32>
    %243 = arith.mulf %239, %225 : vector<2x64xf32>
    %244 = arith.mulf %238, %242 : vector<2x64xf32>
    %245 = arith.addf %243, %244 : vector<2x64xf32>
    %246 = math.tanh %245 : vector<2x64xf32>
    %247 = arith.mulf %240, %246 : vector<2x64xf32>
    %248 = vector.extract_strided_slice %185 {offsets = [6, 0], sizes = [2, 256], strides = [1, 1]} : vector<16x256xf32> to vector<2x256xf32>
    %249 = arith.truncf %247 : vector<2x64xf32> to vector<2x64xbf16>
    %cst_35 = arith.constant dense<0.000000e+00> : vector<2x256xf32>
    %250 = tpu.matmul %249, %171, %cst_35 {dimension_numbers = #tpu.dot_dimension_numbers<[1], [0], [0], [1], [0, 0, 1, 1], [], []>} : vector<2x64xbf16>, vector<64x256xbf16>, vector<2x256xf32> -> vector<2x256xf32>
    %251 = arith.addf %248, %250 : vector<2x256xf32>
    %252 = vector.extract_strided_slice %251 {offsets = [0, 0], sizes = [2, 192], strides = [1, 1]} : vector<2x256xf32> to vector<2x192xf32>
    %253 = arith.negf %252 : vector<2x192xf32>
    %254 = math.exp %253 : vector<2x192xf32>
    %cst_36 = arith.constant 1.000000e+00 : f32
    %255 = vector.broadcast %cst_36 : f32 to vector<2x192xf32>
    %256 = arith.addf %255, %254 : vector<2x192xf32>
    %257 = arith.divf %255, %256 : vector<2x192xf32>
    %258 = vector.extract_strided_slice %257 {offsets = [0, 0], sizes = [2, 64], strides = [1, 1]} : vector<2x192xf32> to vector<2x64xf32>
    %259 = vector.extract_strided_slice %257 {offsets = [0, 64], sizes = [2, 64], strides = [1, 1]} : vector<2x192xf32> to vector<2x64xf32>
    %260 = vector.extract_strided_slice %257 {offsets = [0, 128], sizes = [2, 64], strides = [1, 1]} : vector<2x192xf32> to vector<2x64xf32>
    %261 = vector.extract_strided_slice %251 {offsets = [0, 192], sizes = [2, 64], strides = [1, 1]} : vector<2x256xf32> to vector<2x64xf32>
    %262 = math.tanh %261 : vector<2x64xf32>
    %263 = arith.mulf %259, %245 : vector<2x64xf32>
    %264 = arith.mulf %258, %262 : vector<2x64xf32>
    %265 = arith.addf %263, %264 : vector<2x64xf32>
    %266 = math.tanh %265 : vector<2x64xf32>
    %267 = arith.mulf %260, %266 : vector<2x64xf32>
    %268 = vector.extract_strided_slice %185 {offsets = [8, 0], sizes = [2, 256], strides = [1, 1]} : vector<16x256xf32> to vector<2x256xf32>
    %269 = arith.truncf %267 : vector<2x64xf32> to vector<2x64xbf16>
    %cst_37 = arith.constant dense<0.000000e+00> : vector<2x256xf32>
    %270 = tpu.matmul %269, %171, %cst_37 {dimension_numbers = #tpu.dot_dimension_numbers<[1], [0], [0], [1], [0, 0, 1, 1], [], []>} : vector<2x64xbf16>, vector<64x256xbf16>, vector<2x256xf32> -> vector<2x256xf32>
    %271 = arith.addf %268, %270 : vector<2x256xf32>
    %272 = vector.extract_strided_slice %271 {offsets = [0, 0], sizes = [2, 192], strides = [1, 1]} : vector<2x256xf32> to vector<2x192xf32>
    %273 = arith.negf %272 : vector<2x192xf32>
    %274 = math.exp %273 : vector<2x192xf32>
    %cst_38 = arith.constant 1.000000e+00 : f32
    %275 = vector.broadcast %cst_38 : f32 to vector<2x192xf32>
    %276 = arith.addf %275, %274 : vector<2x192xf32>
    %277 = arith.divf %275, %276 : vector<2x192xf32>
    %278 = vector.extract_strided_slice %277 {offsets = [0, 0], sizes = [2, 64], strides = [1, 1]} : vector<2x192xf32> to vector<2x64xf32>
    %279 = vector.extract_strided_slice %277 {offsets = [0, 64], sizes = [2, 64], strides = [1, 1]} : vector<2x192xf32> to vector<2x64xf32>
    %280 = vector.extract_strided_slice %277 {offsets = [0, 128], sizes = [2, 64], strides = [1, 1]} : vector<2x192xf32> to vector<2x64xf32>
    %281 = vector.extract_strided_slice %271 {offsets = [0, 192], sizes = [2, 64], strides = [1, 1]} : vector<2x256xf32> to vector<2x64xf32>
    %282 = math.tanh %281 : vector<2x64xf32>
    %283 = arith.mulf %279, %265 : vector<2x64xf32>
    %284 = arith.mulf %278, %282 : vector<2x64xf32>
    %285 = arith.addf %283, %284 : vector<2x64xf32>
    %286 = math.tanh %285 : vector<2x64xf32>
    %287 = arith.mulf %280, %286 : vector<2x64xf32>
    %288 = vector.extract_strided_slice %185 {offsets = [10, 0], sizes = [2, 256], strides = [1, 1]} : vector<16x256xf32> to vector<2x256xf32>
    %289 = arith.truncf %287 : vector<2x64xf32> to vector<2x64xbf16>
    %cst_39 = arith.constant dense<0.000000e+00> : vector<2x256xf32>
    %290 = tpu.matmul %289, %171, %cst_39 {dimension_numbers = #tpu.dot_dimension_numbers<[1], [0], [0], [1], [0, 0, 1, 1], [], []>} : vector<2x64xbf16>, vector<64x256xbf16>, vector<2x256xf32> -> vector<2x256xf32>
    %291 = arith.addf %288, %290 : vector<2x256xf32>
    %292 = vector.extract_strided_slice %291 {offsets = [0, 0], sizes = [2, 192], strides = [1, 1]} : vector<2x256xf32> to vector<2x192xf32>
    %293 = arith.negf %292 : vector<2x192xf32>
    %294 = math.exp %293 : vector<2x192xf32>
    %cst_40 = arith.constant 1.000000e+00 : f32
    %295 = vector.broadcast %cst_40 : f32 to vector<2x192xf32>
    %296 = arith.addf %295, %294 : vector<2x192xf32>
    %297 = arith.divf %295, %296 : vector<2x192xf32>
    %298 = vector.extract_strided_slice %297 {offsets = [0, 0], sizes = [2, 64], strides = [1, 1]} : vector<2x192xf32> to vector<2x64xf32>
    %299 = vector.extract_strided_slice %297 {offsets = [0, 64], sizes = [2, 64], strides = [1, 1]} : vector<2x192xf32> to vector<2x64xf32>
    %300 = vector.extract_strided_slice %297 {offsets = [0, 128], sizes = [2, 64], strides = [1, 1]} : vector<2x192xf32> to vector<2x64xf32>
    %301 = vector.extract_strided_slice %291 {offsets = [0, 192], sizes = [2, 64], strides = [1, 1]} : vector<2x256xf32> to vector<2x64xf32>
    %302 = math.tanh %301 : vector<2x64xf32>
    %303 = arith.mulf %299, %285 : vector<2x64xf32>
    %304 = arith.mulf %298, %302 : vector<2x64xf32>
    %305 = arith.addf %303, %304 : vector<2x64xf32>
    %306 = math.tanh %305 : vector<2x64xf32>
    %307 = arith.mulf %300, %306 : vector<2x64xf32>
    %308 = vector.extract_strided_slice %185 {offsets = [12, 0], sizes = [2, 256], strides = [1, 1]} : vector<16x256xf32> to vector<2x256xf32>
    %309 = arith.truncf %307 : vector<2x64xf32> to vector<2x64xbf16>
    %cst_41 = arith.constant dense<0.000000e+00> : vector<2x256xf32>
    %310 = tpu.matmul %309, %171, %cst_41 {dimension_numbers = #tpu.dot_dimension_numbers<[1], [0], [0], [1], [0, 0, 1, 1], [], []>} : vector<2x64xbf16>, vector<64x256xbf16>, vector<2x256xf32> -> vector<2x256xf32>
    %311 = arith.addf %308, %310 : vector<2x256xf32>
    %312 = vector.extract_strided_slice %311 {offsets = [0, 0], sizes = [2, 192], strides = [1, 1]} : vector<2x256xf32> to vector<2x192xf32>
    %313 = arith.negf %312 : vector<2x192xf32>
    %314 = math.exp %313 : vector<2x192xf32>
    %cst_42 = arith.constant 1.000000e+00 : f32
    %315 = vector.broadcast %cst_42 : f32 to vector<2x192xf32>
    %316 = arith.addf %315, %314 : vector<2x192xf32>
    %317 = arith.divf %315, %316 : vector<2x192xf32>
    %318 = vector.extract_strided_slice %317 {offsets = [0, 0], sizes = [2, 64], strides = [1, 1]} : vector<2x192xf32> to vector<2x64xf32>
    %319 = vector.extract_strided_slice %317 {offsets = [0, 64], sizes = [2, 64], strides = [1, 1]} : vector<2x192xf32> to vector<2x64xf32>
    %320 = vector.extract_strided_slice %317 {offsets = [0, 128], sizes = [2, 64], strides = [1, 1]} : vector<2x192xf32> to vector<2x64xf32>
    %321 = vector.extract_strided_slice %311 {offsets = [0, 192], sizes = [2, 64], strides = [1, 1]} : vector<2x256xf32> to vector<2x64xf32>
    %322 = math.tanh %321 : vector<2x64xf32>
    %323 = arith.mulf %319, %305 : vector<2x64xf32>
    %324 = arith.mulf %318, %322 : vector<2x64xf32>
    %325 = arith.addf %323, %324 : vector<2x64xf32>
    %326 = math.tanh %325 : vector<2x64xf32>
    %327 = arith.mulf %320, %326 : vector<2x64xf32>
    %328 = vector.extract_strided_slice %185 {offsets = [14, 0], sizes = [2, 256], strides = [1, 1]} : vector<16x256xf32> to vector<2x256xf32>
    %329 = arith.truncf %327 : vector<2x64xf32> to vector<2x64xbf16>
    %cst_43 = arith.constant dense<0.000000e+00> : vector<2x256xf32>
    %330 = tpu.matmul %329, %171, %cst_43 {dimension_numbers = #tpu.dot_dimension_numbers<[1], [0], [0], [1], [0, 0, 1, 1], [], []>} : vector<2x64xbf16>, vector<64x256xbf16>, vector<2x256xf32> -> vector<2x256xf32>
    %331 = arith.addf %328, %330 : vector<2x256xf32>
    %332 = vector.extract_strided_slice %331 {offsets = [0, 0], sizes = [2, 192], strides = [1, 1]} : vector<2x256xf32> to vector<2x192xf32>
    %333 = arith.negf %332 : vector<2x192xf32>
    %334 = math.exp %333 : vector<2x192xf32>
    %cst_44 = arith.constant 1.000000e+00 : f32
    %335 = vector.broadcast %cst_44 : f32 to vector<2x192xf32>
    %336 = arith.addf %335, %334 : vector<2x192xf32>
    %337 = arith.divf %335, %336 : vector<2x192xf32>
    %338 = vector.extract_strided_slice %337 {offsets = [0, 0], sizes = [2, 64], strides = [1, 1]} : vector<2x192xf32> to vector<2x64xf32>
    %339 = vector.extract_strided_slice %337 {offsets = [0, 64], sizes = [2, 64], strides = [1, 1]} : vector<2x192xf32> to vector<2x64xf32>
    %340 = vector.extract_strided_slice %337 {offsets = [0, 128], sizes = [2, 64], strides = [1, 1]} : vector<2x192xf32> to vector<2x64xf32>
    %341 = vector.extract_strided_slice %331 {offsets = [0, 192], sizes = [2, 64], strides = [1, 1]} : vector<2x256xf32> to vector<2x64xf32>
    %342 = math.tanh %341 : vector<2x64xf32>
    %343 = arith.mulf %339, %325 : vector<2x64xf32>
    %344 = arith.mulf %338, %342 : vector<2x64xf32>
    %345 = arith.addf %343, %344 : vector<2x64xf32>
    %346 = math.tanh %345 : vector<2x64xf32>
    %347 = arith.mulf %340, %346 : vector<2x64xf32>
    %348 = tpu.concatenate %169, %347 in 1 : vector<2x64xf32>, vector<2x64xf32> -> vector<2x128xf32>
    %349 = arith.truncf %348 : vector<2x128xf32> to vector<2x128xbf16>
    %c320 = arith.constant 320 : index
    %c0_45 = arith.constant 0 : index
    %350 = vector.load %arg1[%c320, %c0_45] : memref<448x256xbf16, #tpu.memory_space<vmem>>, vector<128x256xbf16>
    %351 = vector.extract_strided_slice %0 {offsets = [2, 0], sizes = [1, 4], strides = [1, 1]} : vector<3x256xf32> to vector<1x4xf32>
    %cst_46 = arith.constant dense<0.000000e+00> : vector<2x256xf32>
    %352 = tpu.matmul %349, %350, %cst_46 {dimension_numbers = #tpu.dot_dimension_numbers<[1], [0], [0], [1], [0, 0, 1, 1], [], []>} : vector<2x128xbf16>, vector<128x256xbf16>, vector<2x256xf32> -> vector<2x256xf32>
    %353 = vector.extract_strided_slice %352 {offsets = [0, 0], sizes = [2, 4], strides = [1, 1]} : vector<2x256xf32> to vector<2x4xf32>
    %354 = vector.broadcast %351 : vector<1x4xf32> to vector<2x4xf32>
    %355 = arith.addf %353, %354 : vector<2x4xf32>
    %cst_47 = arith.constant dense<0xFF800000> : vector<2xf32>
    %356 = vector.multi_reduction <maximumf>, %355, %cst_47 [1] : vector<2x4xf32> to vector<2xf32>
    %357 = vector.shape_cast %356 : vector<2xf32> to vector<2x1xf32>
    %358 = vector.broadcast %357 : vector<2x1xf32> to vector<2x4xf32>
    %359 = arith.subf %355, %358 : vector<2x4xf32>
    %360 = math.exp %359 : vector<2x4xf32>
    %cst_48 = arith.constant dense<0.000000e+00> : vector<2xf32>
    %361 = vector.multi_reduction <add>, %360, %cst_48 [1] : vector<2x4xf32> to vector<2xf32>
    %362 = vector.shape_cast %361 : vector<2xf32> to vector<2x1xf32>
    %363 = math.log %362 : vector<2x1xf32>
    %364 = vector.broadcast %363 : vector<2x1xf32> to vector<2x4xf32>
    %365 = arith.subf %359, %364 : vector<2x4xf32>
    %c0_49 = arith.constant 0 : index
    %c0_50 = arith.constant 0 : index
    %366 = vector.load %arg3[%c0_49, %c0_50] : memref<2x4xf32, #tpu.memory_space<vmem>>, vector<2x4xf32>
    tpu.vector_store %arg3[%c0_49, %c0_50], %365 {strides = array<i32>} : memref<2x4xf32, #tpu.memory_space<vmem>>, vector<2x4xf32>,
    return
  }
}

</mosaic_0001>

<bundles_post_ra>
// kernel: textrnn_forward.1
= control target key start
LH: loop header
LB: loop body
LE: loop exit
PB: predicated region body
PF: predicated region fallthrough
CT: control target
= control target key end

     0   :  { %8 = vsyncpa [#allocation3], 0  ;;  %s2891_s0 = inlined_call_operand.vmem [shape: bf16[16,64], index: 0, kind: input, shape index: {}]   ;;  %s2892_s1 = inlined_call_operand.hbm [shape: bf16[448,256], index: 1, kind: input, shape index: {}]   ;;  %s2893_s2 = inlined_call_operand.vmem [shape: f32[3,256], index: 2, kind: input, shape index: {}]   ;;  %s2894_s3 = inlined_call_operand.hbm [shape: f32[2,4], index: 3, kind: output, shape index: {}]  }
   0x1   :  { %9 = vsyncpa [#allocation4], 0  ;;  %s2463_s12 = smov [#allocation2]   ;;  %s2415_s16 = scalar_lea.hbm %s2892_s1, 7168 }
   0x2   :  { %s17_s13 = sshll.u32 %s2463_s12, 4  ;;  %p2416_p0 = scmp.ne.s32.totalorder %s2892_s1, %s2415_s16  ;;  %s18_s13 = int_to_ptr.vmem [resolvable:$true] %s17_s13 }
   0x3   :  { %p2419_p1 = scmp.lt.u32.totalorder %s2415_s16, %s2892_s1 }
   0x5   :  { %p2421_p2 = pnand %p2419_p1, %p2416_p0 }
   0x7   :  { %2424 = shalt.err (!%p2421_p2)
}
   0x8   :  { %s2425_s21 = scalar_lea.vmem %s18_s13, 7168  ;;  %p2430_p4 = scmp.lt.s32.totalorder %s18_s13, %s18_s13 }
   0x9   :  { %p2426_p3 = scmp.ne.s32.totalorder %s18_s13, %s2425_s21  ;;  %p2431_p5 = scmp.lt.s32.totalorder %s2425_s21, %s2425_s21 }
   0xb   :  { %p2432_p6 = por %p2431_p5, %p2430_p4 }
   0xd   :  { %p2433_p7 = pnand %p2432_p6, %p2426_p3 }
   0xf   :  { %2436 = shalt.err (!%p2433_p7)
}
  0x10   :  { %s2464_s22 = smov 128   ;;  %s2465_s23 = smov 8  }
  0x11   :  { %23 = dma.hbm_to_vmem [thread:$0]  %s2892_s1, 7168, %s18_s13, [#allocation3], %s2464_s22, %s2464_s22, %s2465_s23  }
  0x12   :  { %2459 = dma.done.wait [#allocation3], 7168  }
  0x13   :  { %2460 = vsyncadd [#allocation3], 4294960128  ;;  %v2466_v0 = vmov 0   ;;  %v2133_v1 = vld [vmem:[#allocation2 + $0x4] ss:$8 sps:$4 sm:$0xff]   ;;  %vm113_vm0 = vcmask 523264   ;;  %v50_v18 = vlaneseq }
  0x14   :  { %149 = vmatprep.mubr.bf16.mxu0 %v2466_v0  ;;  %235 = vmatprep.mubr.bf16.mxu1 %v2466_v0  ;;  %v2503_v2 = vld [vmem:[#allocation2 + $0xc4] ss:$8 sps:$4 sm:$0xff]   ;;  %v2137_v3 = vld [vmem:[#allocation2] ss:$8 sps:$4 sm:$0xff]   ;;  %v2139_v5 = vld [vmem:[#allocation2 + $0x14] ss:$8 sps:$4 sm:$0xff]  }
  0x15   :  { %117 = vmatprep.subr.bf16.mxu0 %v2133_v1  ;;  %v2505_v4 = vld [vmem:[#allocation2 + $0xc0] ss:$8 sps:$4 sm:$0xff]   ;;  %203 = vmatprep.subr.bf16.mxu1 %v2503_v2  ;;  %v2509_v6 = vld [vmem:[#allocation2 + $0xd4] ss:$8 sps:$4 sm:$0xff]   ;;  %v2143_v7 = vld [vmem:[#allocation2 + $0x10] ss:$8 sps:$4 sm:$0xff]  }
  0x16   :  { %118 = vmatpush1.bf16.msra.mxu0 %v2137_v3  ;;  %204 = vmatpush1.bf16.msra.mxu1 %v2505_v4  ;;  %v2511_v8 = vld [vmem:[#allocation2 + $0xd0] ss:$8 sps:$4 sm:$0xff]   ;;  %v2145_v9 = vld [vmem:[#allocation2 + $0x24] ss:$8 sps:$4 sm:$0xff]   ;;  %v2149_v11 = vld [vmem:[#allocation2 + $0x20] ss:$8 sps:$4 sm:$0xff]  }
  0x17   :  { %119 = vmatprep.subr.bf16.mxu0 %v2139_v5  ;;  %205 = vmatprep.subr.bf16.mxu1 %v2509_v6  ;;  %v2514_v10 = vld [vmem:[#allocation2 + $0xe4] ss:$8 sps:$4 sm:$0xff]   ;;  %v2516_v12 = vld [vmem:[#allocation2 + $0xe0] ss:$8 sps:$4 sm:$0xff]   ;;  %v2151_v13 = vld [vmem:[#allocation2 + $0x34] ss:$8 sps:$4 sm:$0xff]  }
  0x18   :  { %v2520_v14 = vld [vmem:[#allocation2 + $0xf4] ss:$8 sps:$4 sm:$0xff]   ;;  %v2155_v15 = vld [vmem:[#allocation2 + $0x30] ss:$8 sps:$4 sm:$0xff]   ;;  %v2157_v17 = vld [vmem:[%s2891_s0] sm:$0xff]   ;;  %v2552_v19 = vshrl.u32 %v50_v18, 7 }
  0x19   :  { %v2522_v16 = vld [vmem:[#allocation2 + $0xf0] ss:$8 sps:$4 sm:$0xff]   ;;  %v2558_v21 = vld [vmem:[%s2893_s2] sm:$0x77]  ;;  %s2467_s28 = smov 64   ;;  %vm954_vm1 = vcmask 1041408  }
  0x1a   :  { %120 = vmatpush1.bf16.msra.mxu0 %v2143_v7  ;;  %206 = vmatpush1.bf16.msra.mxu1 %v2511_v8  ;;  %v56_v20 = vsub.s32 4, %v2552_v19  ;;  %v52_v22 = vsub.s32 0, %v2552_v19  ;;  %vm956_vm2 = vcmask 1043456   ;;  %vm958_vm3 = vcmask 1045504  }
  0x1b   :  { %121 = vmatprep.subr.bf16.mxu0 %v2145_v9  ;;  %207 = vmatprep.subr.bf16.mxu1 %v2514_v10  ;;  %vm1974_vm4 = vcmask 25600  }
  0x1c   :  { %v57_v23 = vrot.slane %v2558_v21, %v56_v20  ;;  %v53_v24 = vrot.slane %v2558_v21, %v52_v22 }
  0x1e   :  { %122 = vmatpush1.bf16.msra.mxu0 %v2149_v11  ;;  %208 = vmatpush1.bf16.msra.mxu1 %v2516_v12  ;;  %v67_v25 = vrot.slane %v57_v23, %v52_v22  ;;  %v63_v28 = vrot.slane %v53_v24, %v52_v22 }
  0x1f   :  { %123 = vmatprep.subr.bf16.mxu0 %v2151_v13  ;;  %209 = vmatprep.subr.bf16.mxu1 %v2520_v14 }
  0x22   :  { %124 = vmatpush1.bf16.msra.mxu0 %v2155_v15  ;;  %210 = vmatpush1.bf16.msra.mxu1 %v2522_v16 }
  0x23   :  { %280 = vmatprep.subr.bf16.mxu0 %v2503_v2  ;;  %368 = vmatprep.subr.bf16.mxu1 %v2503_v2 }
  0x25   :  { %2012 = vmatmul.mubr.msk.bf16.vlgmr.msra.gmra.mrb[0].mxu0 %vm113_vm0, %v2157_v17  ;;  %236 = vmatmul.mubr.bf16.vlgmr.msra.gmra.mrb[0].mxu1 %v2466_v0 }
  0x26   :  { %281 = vmatpush1.bf16.msra.mxu0 %v2505_v4  ;;  %312 = vmatprep.mubr.bf16.mxu0 %v2466_v0 }
  0x27   :  { %282 = vmatprep.subr.bf16.mxu0 %v2509_v6  ;;  %369 = vmatpush1.bf16.msra.mxu1 %v2505_v4 }
  0x28   :  { %370 = vmatprep.subr.bf16.mxu1 %v2509_v6  ;;  %400 = vmatprep.mubr.bf16.mxu1 %v2466_v0 }
  0x2a   :  { %283 = vmatpush1.bf16.msra.mxu0 %v2511_v8 }
  0x2b   :  { %284 = vmatprep.subr.bf16.mxu0 %v2514_v10  ;;  %371 = vmatpush1.bf16.msra.mxu1 %v2511_v8 }
  0x2c   :  { %372 = vmatprep.subr.bf16.mxu1 %v2514_v10 }
  0x2e   :  { %285 = vmatpush1.bf16.msra.mxu0 %v2516_v12 }
  0x2f   :  { %286 = vmatprep.subr.bf16.mxu0 %v2520_v14  ;;  %373 = vmatpush1.bf16.msra.mxu1 %v2516_v12 }
  0x30   :  { %374 = vmatprep.subr.bf16.mxu1 %v2520_v14 }
  0x32   :  { %287 = vmatpush1.bf16.msra.mxu0 %v2522_v16 }
  0x33   :  { %375 = vmatpush1.bf16.msra.mxu1 %v2522_v16  ;;  %456 = vmatprep.subr.bf16.mxu0 %v2503_v2 }
  0x34   :  { %544 = vmatprep.subr.bf16.mxu1 %v2503_v2 }
  0xf8   :  { %v151_v26 = vpop.f32.mrb[0].mxu0  ;;  %v237_v27 = vpop.f32.mrb[0].mxu1 }
  0xf9   :  { %v153_v29 = vpop.f32.mrb[1].mxu0  ;;  %v239_v30 = vpop.f32.mrb[1].mxu1  ;;  %v2571_v40 = vadd.f32 %v151_v26, %v63_v28 }
  0xfa   :  { %v2563_v31 = vadd.f32 %v153_v29, %v67_v25  ;;  %v155_v32 = vpop.f32.mrb[2].mxu0  ;;  %v241_v33 = vpop.f32.mrb[2].mxu1 }
  0xfb   :  { %v2565_v34 = vadd.f32 %v155_v32, %v63_v28  ;;  %v157_v35 = vpop.f32.mrb[3].mxu0  ;;  %v242_v36 = vpop.f32.mrb[3].mxu1  ;;  %v244_v41 = vadd.f32 %v237_v27, %v2571_v40 }
  0xfc   :  { %v245_v37 = vadd.f32 %v239_v30, %v2563_v31  ;;  %v2568_v38 = vadd.f32 %v157_v35, %v67_v25 }
  0xfd   :  { %v2021_v42 = vmul.f32 -1.442695, %v244_v41 }
  0xfe   :  { %2218 = vtanh.f32 %v245_v37  ;;  %v2022_v52 = vmul.f32 -1.442695, %v245_v37 }
  0xff   :  { %2220 = vpow2.f32 %v2021_v42 }
 0x108   :  { %v2219_v39 = vpop.eup %2218 }
 0x109   :  { %261 = vrot.lane.b32.xlu0 %v2219_v39, %s2467_s28  ;;  %v2221_v43 = vpop.eup %2220 }
 0x10a   :  { %v252_v44 = vadd.f32 1.0, %v2221_v43 }
 0x10c   :  { %2222 = vrcp.f32 %v252_v44 }
 0x116   :  { %v2223_v45 = vpop.eup %2222 }
 0x117   :  { %v259_v48 = vmul.f32 0.0, %v2223_v45 }
 0x17b   :  { %v262_v46 = vpop.permute.xlu0 %261 }
 0x17c   :  { %v264_v47 = vmul.f32 %v2223_v45, %v262_v46 }
 0x17e   :  { %266 = vrot.lane.b32.xlu0 %v264_v47, %s2467_s28 }
 0x1f0   :  { %v267_v49 = vpop.permute.xlu0 %266 }
 0x1f1   :  { %v269_v50 = vadd.f32 %v267_v49, %v259_v48 }
 0x1f3   :  { %2224 = vtanh.f32 %v269_v50  ;;  %v343_v20 = vrot.slane %v269_v50, 6 }
 0x1f4   :  { %2226 = vpow2.f32 %v2022_v52 }
 0x1fd   :  { %v2225_v51 = vpop.eup %2224 }
 0x1fe   :  { %272 = vrot.lane.b32.xlu1 %v2225_v51, %s2467_s28  ;;  %v2227_v53 = vpop.eup %2226 }
 0x1ff   :  { %v253_v54 = vadd.f32 1.0, %v2227_v53 }
 0x201   :  { %2228 = vrcp.f32 %v253_v54 }
 0x20b   :  { %v2229_v55 = vpop.eup %2228 }
 0x270   :  { %v273_v56 = vpop.permute.xlu1 %272 }
 0x271   :  { %v2576_v57 = vmul.f32 %v2229_v55, %v273_v56 }
 0x273   :  { %v276_v58 = vpack.c.bf16 %v2576_v57, %v2576_v57 }
 0x275   :  { %2023 = vmatmul.mubr.msk.bf16.vlgmr.msra.gmra.mrb[4].mxu0 %vm113_vm0, %v276_v58 }
 0x276   :  { %457 = vmatpush1.bf16.msra.mxu0 %v2505_v4  ;;  %488 = vmatprep.mubr.bf16.mxu0 %v2466_v0 }
 0x277   :  { %458 = vmatprep.subr.bf16.mxu0 %v2509_v6 }
 0x27a   :  { %459 = vmatpush1.bf16.msra.mxu0 %v2511_v8 }
 0x27b   :  { %460 = vmatprep.subr.bf16.mxu0 %v2514_v10 }
 0x27e   :  { %461 = vmatpush1.bf16.msra.mxu0 %v2516_v12 }
 0x27f   :  { %462 = vmatprep.subr.bf16.mxu0 %v2520_v14 }
 0x282   :  { %463 = vmatpush1.bf16.msra.mxu0 %v2522_v16 }
 0x283   :  { %624 = vmatprep.subr.bf16.mxu0 %v2503_v2 }
 0x348   :  { %v314_v59 = vpop.f32.mrb[4].mxu0 }
 0x349   :  { %v316_v60 = vpop.f32.mrb[5].mxu0  ;;  %v323_v5 = vrot.slane %v314_v59, 6 }
 0x34a   :  { %v324_v61 = vrot.slane %v316_v60, 6  ;;  %v318_v62 = vpop.f32.mrb[6].mxu0 }
 0x34b   :  { %v319_v63 = vpop.f32.mrb[7].mxu0  ;;  %v327_v7 = vadd.f32 %v323_v5, %v2571_v40 }
 0x34c   :  { %v328_v1 = vadd.f32 %v324_v61, %v2563_v31 }
 0x34d   :  { %v2024_v9 = vmul.f32 -1.442695, %v327_v7 }
 0x34e   :  { %2230 = vtanh.f32 %v328_v1  ;;  %v2025_v26 = vmul.f32 -1.442695, %v328_v1 }
 0x34f   :  { %2232 = vpow2.f32 %v2024_v9 }
 0x358   :  { %v2231_v3 = vpop.eup %2230 }
 0x359   :  { %347 = vrot.lane.b32.xlu1 %v2231_v3, %s2467_s28  ;;  %v2233_v11 = vpop.eup %2232 }
 0x35a   :  { %v335_v13 = vadd.f32 1.0, %v2233_v11 }
 0x35c   :  { %2234 = vrcp.f32 %v335_v13 }
 0x366   :  { %v2235_v15 = vpop.eup %2234 }
 0x367   :  { %v345_v22 = vmul.f32 %v2235_v15, %v343_v20 }
 0x3cb   :  { %v348_v17 = vpop.permute.xlu1 %347 }
 0x3cc   :  { %v350_v18 = vmul.f32 %v2235_v15, %v348_v17 }
 0x3ce   :  { %352 = vrot.lane.b32.xlu0 %v350_v18, %s2467_s28 }
 0x440   :  { %v353_v23 = vpop.permute.xlu0 %352 }
 0x441   :  { %v355_v24 = vadd.f32 %v353_v23, %v345_v22 }
 0x443   :  { %2236 = vtanh.f32 %v355_v24  ;;  %v431_v53 = vrot.slane %v355_v24, 6 }
 0x444   :  { %2238 = vpow2.f32 %v2025_v26 }
 0x44d   :  { %v2237_v25 = vpop.eup %2236 }
 0x44e   :  { %358 = vrot.lane.b32.xlu1 %v2237_v25, %s2467_s28  ;;  %v2239_v27 = vpop.eup %2238 }
 0x44f   :  { %v336_v28 = vadd.f32 1.0, %v2239_v27 }
 0x451   :  { %2240 = vrcp.f32 %v336_v28 }
 0x45b   :  { %v2241_v29 = vpop.eup %2240 }
 0x4c0   :  { %v359_v30 = vpop.permute.xlu1 %358 }
 0x4c1   :  { %v2595_v32 = vmul.f32 %v2241_v29, %v359_v30 }
 0x4c3   :  { %v362_v33 = vpack.c.bf16 %v2595_v32, %v2595_v32 }
 0x4c5   :  { %v364_v35 = vrot.slane %v362_v33, 1 }
 0x4c7   :  { %2026 = vmatmul.mubr.msk.bf16.vlgmr.msra.gmra.mrb[4].mxu1 %vm113_vm0, %v364_v35 }
 0x4c8   :  { %545 = vmatpush1.bf16.msra.mxu1 %v2505_v4  ;;  %576 = vmatprep.mubr.bf16.mxu1 %v2466_v0 }
 0x4c9   :  { %546 = vmatprep.subr.bf16.mxu1 %v2509_v6 }
 0x4cc   :  { %547 = vmatpush1.bf16.msra.mxu1 %v2511_v8 }
 0x4cd   :  { %548 = vmatprep.subr.bf16.mxu1 %v2514_v10 }
 0x4d0   :  { %549 = vmatpush1.bf16.msra.mxu1 %v2516_v12 }
 0x4d1   :  { %550 = vmatprep.subr.bf16.mxu1 %v2520_v14 }
 0x4d4   :  { %551 = vmatpush1.bf16.msra.mxu1 %v2522_v16 }
 0x4d5   :  { %712 = vmatprep.subr.bf16.mxu1 %v2503_v2 }
 0x59a   :  { %v402_v36 = vpop.f32.mrb[4].mxu1 }
 0x59b   :  { %v404_v37 = vpop.f32.mrb[5].mxu1  ;;  %v411_v45 = vrot.slane %v402_v36, 4 }
 0x59c   :  { %v412_v39 = vrot.slane %v404_v37, 4  ;;  %v406_v41 = vpop.f32.mrb[6].mxu1 }
 0x59d   :  { %v407_v42 = vpop.f32.mrb[7].mxu1  ;;  %v415_v46 = vadd.f32 %v411_v45, %v2571_v40 }
 0x59e   :  { %v416_v43 = vadd.f32 %v412_v39, %v2563_v31 }
 0x59f   :  { %v2027_v47 = vmul.f32 -1.442695, %v415_v46 }
 0x5a0   :  { %2242 = vtanh.f32 %v416_v43  ;;  %v2028_v59 = vmul.f32 -1.442695, %v416_v43 }
 0x5a1   :  { %2244 = vpow2.f32 %v2027_v47 }
 0x5aa   :  { %v2243_v44 = vpop.eup %2242 }
 0x5ab   :  { %435 = vrot.lane.b32.xlu0 %v2243_v44, %s2467_s28  ;;  %v2245_v48 = vpop.eup %2244 }
 0x5ac   :  { %v423_v49 = vadd.f32 1.0, %v2245_v48 }
 0x5ae   :  { %2246 = vrcp.f32 %v423_v49 }
 0x5b8   :  { %v2247_v50 = vpop.eup %2246 }
 0x5b9   :  { %v433_v54 = vmul.f32 %v2247_v50, %v431_v53 }
 0x61d   :  { %v436_v51 = vpop.permute.xlu0 %435 }
 0x61e   :  { %v438_v52 = vmul.f32 %v2247_v50, %v436_v51 }
 0x620   :  { %440 = vrot.lane.b32.xlu1 %v438_v52, %s2467_s28 }
 0x692   :  { %v441_v55 = vpop.permute.xlu1 %440 }
 0x693   :  { %v443_v56 = vadd.f32 %v441_v55, %v433_v54 }
 0x695   :  { %2248 = vtanh.f32 %v443_v56  ;;  %v519_v28 = vrot.slane %v443_v56, 6 }
 0x696   :  { %2250 = vpow2.f32 %v2028_v59 }
 0x69f   :  { %v2249_v58 = vpop.eup %2248 }
 0x6a0   :  { %446 = vrot.lane.b32.xlu0 %v2249_v58, %s2467_s28  ;;  %v2251_v60 = vpop.eup %2250 }
 0x6a1   :  { %v424_v61 = vadd.f32 1.0, %v2251_v60 }
 0x6a3   :  { %2252 = vrcp.f32 %v424_v61 }
 0x6ad   :  { %v2253_v62 = vpop.eup %2252 }
 0x712   :  { %v447_v63 = vpop.permute.xlu0 %446 }
 0x713   :  { %v2614_v1 = vmul.f32 %v2253_v62, %v447_v63 }
 0x715   :  { %v450_v3 = vpack.c.bf16 %v2614_v1, %v2614_v1 }
 0x717   :  { %v452_v5 = vrot.slane %v450_v3, 2 }
 0x719   :  { %2029 = vmatmul.mubr.msk.bf16.vlgmr.msra.gmra.mrb[8].mxu0 %vm113_vm0, %v452_v5 }
 0x71a   :  { %625 = vmatpush1.bf16.msra.mxu0 %v2505_v4  ;;  %656 = vmatprep.mubr.bf16.mxu0 %v2466_v0 }
 0x71b   :  { %626 = vmatprep.subr.bf16.mxu0 %v2509_v6 }
 0x71e   :  { %627 = vmatpush1.bf16.msra.mxu0 %v2511_v8 }
 0x71f   :  { %628 = vmatprep.subr.bf16.mxu0 %v2514_v10 }
 0x722   :  { %629 = vmatpush1.bf16.msra.mxu0 %v2516_v12 }
 0x723   :  { %630 = vmatprep.subr.bf16.mxu0 %v2520_v14 }
 0x726   :  { %631 = vmatpush1.bf16.msra.mxu0 %v2522_v16 }
 0x727   :  { %800 = vmatprep.subr.bf16.mxu0 %v2503_v2 }
 0x7ec   :  { %v490_v7 = vpop.f32.mrb[8].mxu0 }
 0x7ed   :  { %v492_v9 = vpop.f32.mrb[9].mxu0  ;;  %v499_v20 = vrot.slane %v490_v7, 2 }
 0x7ee   :  { %v500_v11 = vrot.slane %v492_v9, 2  ;;  %v494_v13 = vpop.f32.mrb[10].mxu0 }
 0x7ef   :  { %v495_v15 = vpop.f32.mrb[11].mxu0  ;;  %v503_v22 = vadd.f32 %v499_v20, %v2571_v40 }
 0x7f0   :  { %v504_v17 = vadd.f32 %v500_v11, %v2563_v31 }
 0x7f1   :  { %v2030_v23 = vmul.f32 -1.442695, %v503_v22 }
 0x7f2   :  { %2254 = vtanh.f32 %v504_v17  ;;  %v2031_v35 = vmul.f32 -1.442695, %v504_v17 }
 0x7f3   :  { %2256 = vpow2.f32 %v2030_v23 }
 0x7fc   :  { %v2255_v18 = vpop.eup %2254 }
 0x7fd   :  { %523 = vrot.lane.b32.xlu1 %v2255_v18, %s2467_s28  ;;  %v2257_v24 = vpop.eup %2256 }
 0x7fe   :  { %v511_v25 = vadd.f32 1.0, %v2257_v24 }
 0x800   :  { %2258 = vrcp.f32 %v511_v25 }
 0x80a   :  { %v2259_v2 = vpop.eup %2258 }
 0x80b   :  { %v521_v29 = vmul.f32 %v2259_v2, %v519_v28 }
 0x86f   :  { %v524_v26 = vpop.permute.xlu1 %523 }
 0x870   :  { %v526_v27 = vmul.f32 %v2259_v2, %v524_v26 }
 0x872   :  { %528 = vrot.lane.b32.xlu0 %v526_v27, %s2467_s28 }
 0x8e4   :  { %v529_v31 = vpop.permute.xlu0 %528 }
 0x8e5   :  { %v531_v30 = vadd.f32 %v529_v31, %v521_v29 }
 0x8e7   :  { %2260 = vtanh.f32 %v531_v30  ;;  %v601_v58 = vrot.slane %v531_v30, 6 }
 0x8e8   :  { %2262 = vpow2.f32 %v2031_v35 }
 0x8f1   :  { %v2261_v33 = vpop.eup %2260 }
 0x8f2   :  { %534 = vrot.lane.b32.xlu1 %v2261_v33, %s2467_s28  ;;  %v2263_v40 = vpop.eup %2262 }
 0x8f3   :  { %v512_v36 = vadd.f32 1.0, %v2263_v40 }
 0x8f5   :  { %2264 = vrcp.f32 %v512_v36 }
 0x8ff   :  { %v2265_v37 = vpop.eup %2264 }
 0x964   :  { %v535_v39 = vpop.permute.xlu1 %534 }
 0x965   :  { %v2633_v41 = vmul.f32 %v2265_v37, %v535_v39 }
 0x967   :  { %v538_v42 = vpack.c.bf16 %v2633_v41, %v2633_v41 }
 0x969   :  { %v540_v43 = vrot.slane %v538_v42, 3 }
 0x96b   :  { %2032 = vmatmul.mubr.msk.bf16.vlgmr.msra.gmra.mrb[8].mxu1 %vm113_vm0, %v540_v43 }
 0x96c   :  { %713 = vmatpush1.bf16.msra.mxu1 %v2505_v4  ;;  %744 = vmatprep.mubr.bf16.mxu1 %v2466_v0 }
 0x96d   :  { %714 = vmatprep.subr.bf16.mxu1 %v2509_v6 }
 0x970   :  { %715 = vmatpush1.bf16.msra.mxu1 %v2511_v8 }
 0x971   :  { %716 = vmatprep.subr.bf16.mxu1 %v2514_v10 }
 0x974   :  { %717 = vmatpush1.bf16.msra.mxu1 %v2516_v12 }
 0x975   :  { %718 = vmatprep.subr.bf16.mxu1 %v2520_v14 }
 0x978   :  { %719 = vmatpush1.bf16.msra.mxu1 %v2522_v16 }
 0xa3e   :  { %v578_v44 = vpop.f32.mrb[8].mxu1 }
 0xa3f   :  { %v580_v45 = vpop.f32.mrb[9].mxu1  ;;  %v585_v50 = vadd.f32 %v578_v44, %v2565_v34 }
 0xa40   :  { %v586_v46 = vadd.f32 %v580_v45, %v2568_v38  ;;  %v582_v47 = vpop.f32.mrb[10].mxu1 }
 0xa41   :  { %v583_v48 = vpop.f32.mrb[11].mxu1  ;;  %v2033_v51 = vmul.f32 -1.442695, %v585_v50 }
 0xa42   :  { %2266 = vtanh.f32 %v586_v46  ;;  %v2034_v63 = vmul.f32 -1.442695, %v586_v46 }
 0xa43   :  { %2268 = vpow2.f32 %v2033_v51 }
 0xa4c   :  { %v2267_v49 = vpop.eup %2266 }
 0xa4d   :  { %605 = vrot.lane.b32.xlu0 %v2267_v49, %s2467_s28  ;;  %v2269_v52 = vpop.eup %2268 }
 0xa4e   :  { %v593_v53 = vadd.f32 1.0, %v2269_v52 }
 0xa50   :  { %2270 = vrcp.f32 %v593_v53 }
 0xa5a   :  { %v2271_v54 = vpop.eup %2270 }
 0xa5b   :  { %v603_v59 = vmul.f32 %v2271_v54, %v601_v58 }
 0xabf   :  { %v606_v55 = vpop.permute.xlu0 %605 }
 0xac0   :  { %v608_v56 = vmul.f32 %v2271_v54, %v606_v55 }
 0xac2   :  { %610 = vrot.lane.b32.xlu1 %v608_v56, %s2467_s28 }
 0xb34   :  { %v611_v60 = vpop.permute.xlu1 %610 }
 0xb35   :  { %v613_v61 = vadd.f32 %v611_v60, %v603_v59 }
 0xb37   :  { %2272 = vtanh.f32 %v613_v61  ;;  %v687_v2 = vrot.slane %v613_v61, 6 }
 0xb38   :  { %2274 = vpow2.f32 %v2034_v63 }
 0xb41   :  { %v2273_v62 = vpop.eup %2272 }
 0xb42   :  { %616 = vrot.lane.b32.xlu0 %v2273_v62, %s2467_s28  ;;  %v2275_v3 = vpop.eup %2274 }
 0xb43   :  { %v594_v5 = vadd.f32 1.0, %v2275_v3 }
 0xb45   :  { %2276 = vrcp.f32 %v594_v5 }
 0xb4f   :  { %v2277_v7 = vpop.eup %2276 }
 0xbb4   :  { %v617_v9 = vpop.permute.xlu0 %616 }
 0xbb5   :  { %v2651_v11 = vmul.f32 %v2277_v7, %v617_v9 }
 0xbb7   :  { %v620_v13 = vpack.c.bf16 %v2651_v11, %v2651_v11 }
 0xbb9   :  { %2035 = vmatmul.mubr.msk.bf16.vlgmr.msra.gmra.mrb[12].mxu0 %vm113_vm0, %v620_v13 }
 0xbba   :  { %801 = vmatpush1.bf16.msra.mxu0 %v2505_v4  ;;  %832 = vmatprep.mubr.bf16.mxu0 %v2466_v0 }
 0xbbb   :  { %802 = vmatprep.subr.bf16.mxu0 %v2509_v6 }
 0xbbe   :  { %803 = vmatpush1.bf16.msra.mxu0 %v2511_v8 }
 0xbbf   :  { %804 = vmatprep.subr.bf16.mxu0 %v2514_v10 }
 0xbc2   :  { %805 = vmatpush1.bf16.msra.mxu0 %v2516_v12 }
 0xbc3   :  { %806 = vmatprep.subr.bf16.mxu0 %v2520_v14 }
 0xbc6   :  { %807 = vmatpush1.bf16.msra.mxu0 %v2522_v16 }
 0xc8c   :  { %v658_v15 = vpop.f32.mrb[12].mxu0 }
 0xc8d   :  { %v660_v17 = vpop.f32.mrb[13].mxu0  ;;  %v667_v6 = vrot.slane %v658_v15, 6 }
 0xc8e   :  { %v668_v18 = vrot.slane %v660_v17, 6  ;;  %v662_v20 = vpop.f32.mrb[14].mxu0 }
 0xc8f   :  { %v663_v22 = vpop.f32.mrb[15].mxu0  ;;  %v671_v8 = vadd.f32 %v667_v6, %v2565_v34 }
 0xc90   :  { %v672_v4 = vadd.f32 %v668_v18, %v2568_v38 }
 0xc91   :  { %v2036_v10 = vmul.f32 -1.442695, %v671_v8 }
 0xc92   :  { %2278 = vtanh.f32 %v672_v4  ;;  %v2037_v31 = vmul.f32 -1.442695, %v672_v4 }
 0xc93   :  { %2280 = vpow2.f32 %v2036_v10 }
 0xc9c   :  { %v2279_v23 = vpop.eup %2278 }
 0xc9d   :  { %691 = vrot.lane.b32.xlu1 %v2279_v23, %s2467_s28  ;;  %v2281_v12 = vpop.eup %2280 }
 0xc9e   :  { %v679_v14 = vadd.f32 1.0, %v2281_v12 }
 0xca0   :  { %2282 = vrcp.f32 %v679_v14 }
 0xcaa   :  { %v2283_v16 = vpop.eup %2282 }
 0xcab   :  { %v689_v26 = vmul.f32 %v2283_v16, %v687_v2 }
 0xd0f   :  { %v692_v24 = vpop.permute.xlu1 %691 }
 0xd10   :  { %v694_v25 = vmul.f32 %v2283_v16, %v692_v24 }
 0xd12   :  { %696 = vrot.lane.b32.xlu0 %v694_v25, %s2467_s28 }
 0xd84   :  { %v697_v27 = vpop.permute.xlu0 %696 }
 0xd85   :  { %v699_v28 = vadd.f32 %v697_v27, %v689_v26 }
 0xd87   :  { %2284 = vtanh.f32 %v699_v28  ;;  %v775_v58 = vrot.slane %v699_v28, 6 }
 0xd88   :  { %2286 = vpow2.f32 %v2037_v31  ;;  %v2158_v31 = vld [vmem:[#allocation2 + $0x40] ss:$8 sps:$4 sm:$0xff]  }
 0xd91   :  { %v2285_v29 = vpop.eup %2284 }
 0xd92   :  { %702 = vrot.lane.b32.xlu1 %v2285_v29, %s2467_s28  ;;  %v2287_v30 = vpop.eup %2286 }
 0xd93   :  { %v680_v33 = vadd.f32 1.0, %v2287_v30  ;;  %v2160_v30 = vld [vmem:[#allocation2 + $0x44] ss:$8 sps:$4 sm:$0xff]  }
 0xd94   :  { %1062 = vmatprep.subr.bf16.mxu1 %v2160_v30 }
 0xd95   :  { %2288 = vrcp.f32 %v680_v33  ;;  %v931_v33 = vrot.slane %v2633_v41, 6 }
 0xd9f   :  { %v2289_v35 = vpop.eup %2288 }
 0xe04   :  { %v703_v40 = vpop.permute.xlu1 %702 }
 0xe05   :  { %v2669_v36 = vmul.f32 %v2289_v35, %v703_v40  ;;  %v2691_v40 = vld [vmem:[#allocation2 + $0x104] ss:$8 sps:$4 sm:$0xff]  }
 0xe06   :  { %1145 = vmatprep.subr.bf16.mxu0 %v2691_v40 }
 0xe07   :  { %v706_v37 = vpack.c.bf16 %v2669_v36, %v2669_v36 }
 0xe09   :  { %v708_v39 = vrot.slane %v706_v37, 1  ;;  %v937_v37 = vrot.slane %v2614_v1, 2 }
 0xe0b   :  { %2038 = vmatmul.mubr.msk.bf16.vlgmr.msra.gmra.mrb[12].mxu1 %vm113_vm0, %v708_v39  ;;  %v2161_v39 = vld [vmem:[#allocation2 + $0x50] ss:$8 sps:$4 sm:$0xff]  }
 0xe0c   :  { %1094 = vmatprep.mubr.bf16.mxu1 %v2466_v0  ;;  %1063 = vmatpush1.bf16.msra.mxu1 %v2158_v31 }
 0xede   :  { %v746_v42 = vpop.f32.mrb[12].mxu1 }
 0xedf   :  { %v748_v43 = vpop.f32.mrb[13].mxu1  ;;  %v755_v49 = vrot.slane %v746_v42, 4  ;;  %v2695_v42 = vld [vmem:[#allocation2 + $0x100] ss:$8 sps:$4 sm:$0xff]  }
 0xee0   :  { %v756_v44 = vrot.slane %v748_v43, 4  ;;  %v750_v45 = vpop.f32.mrb[14].mxu1  ;;  %v2166_v43 = vld [vmem:[#allocation2 + $0x64] ss:$8 sps:$4 sm:$0xff]  }
 0xee1   :  { %v751_v46 = vpop.f32.mrb[15].mxu1  ;;  %v759_v50 = vadd.f32 %v755_v49, %v2565_v34  ;;  %v925_v45 = vrot.slane %v2651_v11, 2  ;;  %v2164_v49 = vld [vmem:[#allocation2 + $0x60] ss:$8 sps:$4 sm:$0xff]  }
 0xee2   :  { %v760_v47 = vadd.f32 %v756_v44, %v2568_v38  ;;  %v2698_v44 = vld [vmem:[#allocation2 + $0x114] ss:$8 sps:$4 sm:$0xff]   ;;  %v2113_v46 = vpack.i.bf16 %v937_v37, %v931_v33 }
 0xee3   :  { %v2039_v51 = vmul.f32 -1.442695, %v759_v50  ;;  %v2169_v50 = vld [vmem:[#allocation2 + $0x74] ss:$8 sps:$4 sm:$0xff]  }
 0xee4   :  { %2290 = vtanh.f32 %v760_v47  ;;  %v2040_v63 = vmul.f32 -1.442695, %v760_v47  ;;  %v2702_v47 = vld [vmem:[#allocation2 + $0x110] ss:$8 sps:$4 sm:$0xff]  }
 0xee5   :  { %2292 = vpow2.f32 %v2039_v51 }
 0xeee   :  { %v2291_v48 = vpop.eup %2290 }
 0xeef   :  { %779 = vrot.lane.b32.xlu0 %v2291_v48, %s2467_s28  ;;  %v2293_v52 = vpop.eup %2292  ;;  %v949_v48 = vrot.slane %v2576_v57, 2 }
 0xef0   :  { %v767_v53 = vadd.f32 1.0, %v2293_v52  ;;  %v2167_v52 = vld [vmem:[#allocation2 + $0x70] ss:$8 sps:$4 sm:$0xff]  }
 0xef1   :  { %v2128_v51 = vpack.i.bf16 %v949_v48, %v925_v45 }
 0xef2   :  { %2294 = vrcp.f32 %v767_v53  ;;  %v2174_v53 = vld [vmem:[#allocation2 + $0x84] ss:$8 sps:$4 sm:$0xff]  }
 0xefc   :  { %v2295_v54 = vpop.eup %2294 }
 0xefd   :  { %v777_v59 = vmul.f32 %v2295_v54, %v775_v58 }
 0xf61   :  { %v780_v55 = vpop.permute.xlu0 %779 }
 0xf62   :  { %v782_v56 = vmul.f32 %v2295_v54, %v780_v55  ;;  %v2172_v54 = vld [vmem:[#allocation2 + $0x80] ss:$8 sps:$4 sm:$0xff]   ;;  %v2180_v55 = vld [vmem:[#allocation2 + $0x94] ss:$8 sps:$4 sm:$0xff]  }
 0xf64   :  { %784 = vrot.lane.b32.xlu1 %v782_v56, %s2467_s28  ;;  %v2178_v56 = vld [vmem:[#allocation2 + $0x90] ss:$8 sps:$4 sm:$0xff]  }
 0xfd6   :  { %v785_v60 = vpop.permute.xlu1 %784 }
 0xfd7   :  { %v787_v61 = vadd.f32 %v785_v60, %v777_v59 }
 0xfd9   :  { %2296 = vtanh.f32 %v787_v61  ;;  %v863_v27 = vrot.slane %v787_v61, 6  ;;  %v2709_v61 = vld [vmem:[#allocation2 + $0x124] ss:$8 sps:$4 sm:$0xff]  }
 0xfda   :  { %2298 = vpow2.f32 %v2040_v63  ;;  %v2711_v63 = vld [vmem:[#allocation2 + $0x120] ss:$8 sps:$4 sm:$0xff]  }
 0xfe3   :  { %v2297_v62 = vpop.eup %2296 }
 0xfe4   :  { %790 = vrot.lane.b32.xlu0 %v2297_v62, %s2467_s28  ;;  %v2299_v3 = vpop.eup %2298  ;;  %v2186_v62 = vld [vmem:[#allocation2 + $0xa4] ss:$8 sps:$4 sm:$0xff]  }
 0xfe5   :  { %v768_v5 = vadd.f32 1.0, %v2299_v3  ;;  %v2184_v3 = vld [vmem:[#allocation2 + $0xa0] ss:$8 sps:$4 sm:$0xff]  }
 0xfe7   :  { %2300 = vrcp.f32 %v768_v5  ;;  %v2715_v5 = vld [vmem:[#allocation2 + $0x134] ss:$8 sps:$4 sm:$0xff]  }
 0xff1   :  { %v2301_v7 = vpop.eup %2300 }
0x1056   :  { %v791_v9 = vpop.permute.xlu0 %790 }
0x1057   :  { %v2680_v13 = vmul.f32 %v2301_v7, %v791_v9  ;;  %v2192_v7 = vld [vmem:[#allocation2 + $0xb4] ss:$8 sps:$4 sm:$0xff]   ;;  %v2717_v9 = vld [vmem:[#allocation2 + $0x130] ss:$8 sps:$4 sm:$0xff]  }
0x1059   :  { %v794_v15 = vpack.c.bf16 %v2680_v13, %v2680_v13 }
0x105b   :  { %v796_v17 = vrot.slane %v794_v15, 2 }
0x105d   :  { %2041 = vmatmul.mubr.msk.bf16.vlgmr.msra.gmra.mrb[16].mxu0 %vm113_vm0, %v796_v17 }
0x105e   :  { %1177 = vmatprep.mubr.bf16.mxu0 %v2466_v0  ;;  %1146 = vmatpush1.bf16.msra.mxu0 %v2695_v42 }
0x105f   :  { %1147 = vmatprep.subr.bf16.mxu0 %v2698_v44 }
0x1062   :  { %1148 = vmatpush1.bf16.msra.mxu0 %v2702_v47 }
0x1063   :  { %1149 = vmatprep.subr.bf16.mxu0 %v2709_v61 }
0x1066   :  { %1150 = vmatpush1.bf16.msra.mxu0 %v2711_v63 }
0x1067   :  { %1151 = vmatprep.subr.bf16.mxu0 %v2715_v5 }
0x106a   :  { %1152 = vmatpush1.bf16.msra.mxu0 %v2717_v9 }
0x106b   :  { %1222 = vmatprep.subr.bf16.mxu0 %v2691_v40 }
0x106d   :  { %1178 = vmatmul.mubr.bf16.vlgmr.msra.gmra.mrb[20].mxu0 %v2466_v0 }
0x106e   :  { %1223 = vmatpush1.bf16.msra.mxu0 %v2695_v42  ;;  %1254 = vmatprep.mubr.bf16.mxu0 %v2466_v0 }
0x106f   :  { %1224 = vmatprep.subr.bf16.mxu0 %v2698_v44 }
0x1072   :  { %1225 = vmatpush1.bf16.msra.mxu0 %v2702_v47 }
0x1073   :  { %1226 = vmatprep.subr.bf16.mxu0 %v2709_v61 }
0x1076   :  { %1227 = vmatpush1.bf16.msra.mxu0 %v2711_v63 }
0x1077   :  { %1228 = vmatprep.subr.bf16.mxu0 %v2715_v5 }
0x107a   :  { %1229 = vmatpush1.bf16.msra.mxu0 %v2717_v9 }
0x107b   :  { %1398 = vmatprep.subr.bf16.mxu0 %v2691_v40 }
0x1130   :  { %v834_v18 = vpop.f32.mrb[16].mxu0 }
0x1131   :  { %v836_v20 = vpop.f32.mrb[17].mxu0  ;;  %v843_v10 = vrot.slane %v834_v18, 2  ;;  %v2190_v18 = vld [vmem:[#allocation2 + $0xb0] ss:$8 sps:$4 sm:$0xff]  }
0x1132   :  { %v844_v22 = vrot.slane %v836_v20, 2  ;;  %v838_v4 = vpop.f32.mrb[18].mxu0 }
0x1133   :  { %v839_v23 = vpop.f32.mrb[19].mxu0  ;;  %v847_v12 = vadd.f32 %v843_v10, %v2565_v34  ;;  %v2163_v34 = vld [vmem:[#allocation2 + $0x54] ss:$8 sps:$4 sm:$0xff]  }
0x1134   :  { %v848_v6 = vadd.f32 %v844_v22, %v2568_v38  ;;  %1064 = vmatprep.subr.bf16.mxu1 %v2163_v34  ;;  %v913_v22 = vrot.slane %v2680_v13, 2  ;;  %v919_v23 = vrot.slane %v2669_v36, 6 }
0x1135   :  { %v2042_v14 = vmul.f32 -1.442695, %v847_v12  ;;  %1065 = vmatpush1.bf16.msra.mxu1 %v2161_v39 }
0x1136   :  { %2302 = vtanh.f32 %v848_v6  ;;  %1066 = vmatprep.subr.bf16.mxu1 %v2166_v43  ;;  %v2043_v58 = vmul.f32 -1.442695, %v848_v6 }
0x1137   :  { %2304 = vpow2.f32 %v2042_v14 }
0x1139   :  { %1067 = vmatpush1.bf16.msra.mxu1 %v2164_v49 }
0x113a   :  { %1068 = vmatprep.subr.bf16.mxu1 %v2169_v50 }
0x113d   :  { %1069 = vmatpush1.bf16.msra.mxu1 %v2167_v52  ;;  %v966_v52 = vsub.s32 1, %v2552_v19 }
0x113e   :  { %1070 = vmatprep.subr.bf16.mxu1 %v2174_v53 }
0x1140   :  { %v2303_v8 = vpop.eup %2302 }
0x1141   :  { %867 = vrot.lane.b32.xlu1 %v2303_v8, %s2467_s28  ;;  %v2305_v16 = vpop.eup %2304  ;;  %1071 = vmatpush1.bf16.msra.mxu1 %v2172_v54  ;;  %v943_v8 = vrot.slane %v2595_v32, 6  ;;  %v967_v54 = vrot.slane %v2558_v21, %v966_v52 }
0x1142   :  { %v855_v24 = vadd.f32 1.0, %v2305_v16  ;;  %1072 = vmatprep.subr.bf16.mxu1 %v2180_v55 }
0x1143   :  { %v2123_v10 = vpack.i.bf16 %v943_v8, %v919_v23 }
0x1144   :  { %2306 = vrcp.f32 %v855_v24 }
0x1145   :  { %1073 = vmatpush1.bf16.msra.mxu1 %v2178_v56 }
0x1146   :  { %1074 = vmatprep.subr.bf16.mxu1 %v2186_v62 }
0x1149   :  { %1075 = vmatpush1.bf16.msra.mxu1 %v2184_v3 }
0x114a   :  { %1076 = vmatprep.subr.bf16.mxu1 %v2192_v7 }
0x114d   :  { %1077 = vmatpush1.bf16.msra.mxu1 %v2190_v18 }
0x114e   :  { %v2307_v25 = vpop.eup %2306  ;;  %1310 = vmatprep.subr.bf16.mxu1 %v2691_v40 }
0x114f   :  { %v865_v28 = vmul.f32 %v2307_v25, %v863_v27 }
0x11b3   :  { %v868_v2 = vpop.permute.xlu1 %867 }
0x11b4   :  { %v870_v26 = vmul.f32 %v2307_v25, %v868_v2 }
0x11b6   :  { %872 = vrot.lane.b32.xlu0 %v870_v26, %s2467_s28 }
0x1228   :  { %v873_v38 = vpop.permute.xlu0 %872 }
0x1229   :  { %v875_v29 = vadd.f32 %v873_v38, %v865_v28 }
0x122b   :  { %2308 = vtanh.f32 %v875_v29 }
0x122c   :  { %2310 = vpow2.f32 %v2043_v58  ;;  %v977_v58 = vrot.slane %v967_v54, %v966_v52 }
0x1235   :  { %v2309_v35 = vpop.eup %2308 }
0x1236   :  { %878 = vrot.lane.b32.xlu1 %v2309_v35, %s2467_s28  ;;  %v2311_v59 = vpop.eup %2310 }
0x1237   :  { %v856_v60 = vadd.f32 1.0, %v2311_v59 }
0x1239   :  { %2312 = vrcp.f32 %v856_v60 }
0x123a   :  { %2114 = vrot.lane.b32.xlu1 %v2113_v46, %s2467_s28 }
0x123e   :  { %2129 = vrot.lane.b32.xlu1 %v2128_v51, %s2467_s28  ;;  %v970_v51 = vsub.s32 5, %v2552_v19 }
0x1240   :  { %v971_v53 = vrot.slane %v2558_v21, %v970_v51 }
0x1242   :  { %v981_v55 = vrot.slane %v971_v53, %v966_v52 }
0x1243   :  { %v2313_v15 = vpop.eup %2312 }
0x12a8   :  { %v879_v17 = vpop.permute.xlu1 %878 }
0x12a9   :  { %v2720_v20 = vmul.f32 %v2313_v15, %v879_v17 }
0x12ab   :  { %v907_v4 = vrot.slane %v2720_v20, 6 }
0x12ac   :  { %v2115_v12 = vpop.permute.xlu1 %2114 }
0x12ad   :  { %v2118_v6 = vpack.i.bf16 %v913_v22, %v907_v4  ;;  %v2117_v14 = vunpack.i.h.bf16 %v2115_v12  ;;  %v2116_v16 = vunpack.i.l.bf16 %v2115_v12 }
0x12af   :  { %2119 = vrot.lane.b32.xlu0 %v2118_v6, %s2467_s28  ;;  %v941_v27 = vsel %vm113_vm0, %v2669_v36, %v2117_v14  ;;  %v935_v28 = vsel %vm113_vm0, %v2651_v11, %v2116_v16 }
0x12b0   :  { %v2130_v25 = vpop.permute.xlu1 %2129  ;;  %v960_v37 = vsel %vm954_vm1, %v935_v28, %v941_v27 }
0x12b1   :  { %v2132_v38 = vunpack.i.h.bf16 %v2130_v25  ;;  %v2131_v29 = vunpack.i.l.bf16 %v2130_v25 }
0x12b3   :  { %2124 = vrot.lane.b32.xlu0 %v2123_v10, %s2467_s28  ;;  %v929_v43 = vsel %vm113_vm0, %v2633_v41, %v2131_v29 }
0x1321   :  { %v2120_v24 = vpop.permute.xlu0 %2119 }
0x1322   :  { %v2122_v2 = vunpack.i.h.bf16 %v2120_v24  ;;  %v2121_v26 = vunpack.i.l.bf16 %v2120_v24 }
0x1324   :  { %v917_v31 = vsel %vm113_vm0, %v2595_v32, %v2122_v2  ;;  %v911_v30 = vsel %vm113_vm0, %v2576_v57, %v2121_v26  ;;  %v953_v32 = vsel %vm113_vm0, %v2720_v20, %v2132_v38 }
0x1325   :  { %v2125_v33 = vpop.permute.xlu0 %2124  ;;  %v955_v39 = vsel %vm954_vm1, %v911_v30, %v917_v31 }
0x1326   :  { %v2127_v34 = vunpack.i.h.bf16 %v2125_v33  ;;  %v2126_v35 = vunpack.i.l.bf16 %v2125_v33 }
0x1328   :  { %v947_v36 = vsel %vm113_vm0, %v2680_v13, %v2127_v34  ;;  %v923_v11 = vsel %vm113_vm0, %v2614_v1, %v2126_v35  ;;  %v1179_v1 = vpop.f32.mrb[20].mxu0 }
0x1329   :  { %v961_v57 = vsel %vm956_vm2, %v960_v37, %v947_v36  ;;  %v957_v45 = vsel %vm956_vm2, %v955_v39, %v923_v11  ;;  %v1181_v41 = vpop.f32.mrb[21].mxu0 }
0x132a   :  { %v959_v46 = vsel %vm958_vm3, %v957_v45, %v929_v43  ;;  %v962_v48 = vsel %vm958_vm3, %v961_v57, %v953_v32  ;;  %v1183_v13 = vpop.f32.mrb[22].mxu0 }
0x132b   :  { %v963_v49 = vpack.c.bf16 %v962_v48, %v959_v46  ;;  %v1184_v50 = vpop.f32.mrb[23].mxu0 }
0x132d   :  { %1095 = vmatmul.mubr.bf16.vlgmr.msra.gmra.mrb[16].mxu1 %v963_v49 }
0x132e   :  { %1311 = vmatpush1.bf16.msra.mxu1 %v2695_v42  ;;  %1342 = vmatprep.mubr.bf16.mxu1 %v2466_v0 }
0x132f   :  { %1312 = vmatprep.subr.bf16.mxu1 %v2698_v44 }
0x1332   :  { %1313 = vmatpush1.bf16.msra.mxu1 %v2702_v47 }
0x1333   :  { %1314 = vmatprep.subr.bf16.mxu1 %v2709_v61 }
0x1336   :  { %1315 = vmatpush1.bf16.msra.mxu1 %v2711_v63 }
0x1337   :  { %1316 = vmatprep.subr.bf16.mxu1 %v2715_v5 }
0x133a   :  { %1317 = vmatpush1.bf16.msra.mxu1 %v2717_v9 }
0x133b   :  { %1486 = vmatprep.subr.bf16.mxu1 %v2691_v40 }
0x1400   :  { %v1096_v56 = vpop.f32.mrb[16].mxu1 }
0x1401   :  { %v1098_v59 = vpop.f32.mrb[17].mxu1  ;;  %v2778_v22 = vadd.f32 %v1096_v56, %v977_v58 }
0x1402   :  { %v2770_v60 = vadd.f32 %v1098_v59, %v981_v55  ;;  %v1100_v62 = vpop.f32.mrb[18].mxu1 }
0x1403   :  { %v2772_v3 = vadd.f32 %v1100_v62, %v977_v58  ;;  %v1102_v7 = vpop.f32.mrb[19].mxu1  ;;  %v1186_v21 = vadd.f32 %v1179_v1, %v2778_v22 }
0x1404   :  { %v1187_v15 = vadd.f32 %v1181_v41, %v2770_v60  ;;  %v2775_v17 = vadd.f32 %v1102_v7, %v981_v55 }
0x1405   :  { %v2068_v4 = vmul.f32 -1.442695, %v1186_v21 }
0x1406   :  { %2314 = vtanh.f32 %v1187_v15  ;;  %v2069_v2 = vmul.f32 -1.442695, %v1187_v15 }
0x1407   :  { %2316 = vpow2.f32 %v2068_v4 }
0x1410   :  { %v2315_v18 = vpop.eup %2314 }
0x1411   :  { %1203 = vrot.lane.b32.xlu0 %v2315_v18, %s2467_s28  ;;  %v2317_v23 = vpop.eup %2316 }
0x1412   :  { %v1194_v6 = vadd.f32 1.0, %v2317_v23 }
0x1414   :  { %2318 = vrcp.f32 %v1194_v6 }
0x141e   :  { %v2319_v8 = vpop.eup %2318 }
0x141f   :  { %v1201_v14 = vmul.f32 0.0, %v2319_v8 }
0x1483   :  { %v1204_v10 = vpop.permute.xlu0 %1203 }
0x1484   :  { %v1206_v12 = vmul.f32 %v2319_v8, %v1204_v10 }
0x1486   :  { %1208 = vrot.lane.b32.xlu1 %v1206_v12, %s2467_s28 }
0x14f8   :  { %v1209_v16 = vpop.permute.xlu1 %1208 }
0x14f9   :  { %v1211_v24 = vadd.f32 %v1209_v16, %v1201_v14 }
0x14fb   :  { %2320 = vtanh.f32 %v1211_v24  ;;  %v1285_v1 = vrot.slane %v1211_v24, 6 }
0x14fc   :  { %2322 = vpow2.f32 %v2069_v2 }
0x1505   :  { %v2321_v25 = vpop.eup %2320 }
0x1506   :  { %1214 = vrot.lane.b32.xlu0 %v2321_v25, %s2467_s28  ;;  %v2323_v26 = vpop.eup %2322 }
0x1507   :  { %v1195_v27 = vadd.f32 1.0, %v2323_v26 }
0x1509   :  { %2324 = vrcp.f32 %v1195_v27 }
0x1513   :  { %v2325_v28 = vpop.eup %2324 }
0x1578   :  { %v1215_v38 = vpop.permute.xlu0 %1214 }
0x1579   :  { %v1217_v29 = vmul.f32 %v2325_v28, %v1215_v38 }
0x157b   :  { %v1218_v31 = vpack.c.bf16 %v1217_v29, %v1217_v29 }
0x157d   :  { %2070 = vmatmul.mubr.msk.bf16.vlgmr.msra.gmra.mrb[24].mxu0 %vm113_vm0, %v1218_v31 }
0x157e   :  { %1399 = vmatpush1.bf16.msra.mxu0 %v2695_v42  ;;  %1430 = vmatprep.mubr.bf16.mxu0 %v2466_v0 }
0x157f   :  { %1400 = vmatprep.subr.bf16.mxu0 %v2698_v44 }
0x1582   :  { %1401 = vmatpush1.bf16.msra.mxu0 %v2702_v47 }
0x1583   :  { %1402 = vmatprep.subr.bf16.mxu0 %v2709_v61 }
0x1586   :  { %1403 = vmatpush1.bf16.msra.mxu0 %v2711_v63 }
0x1587   :  { %1404 = vmatprep.subr.bf16.mxu0 %v2715_v5 }
0x158a   :  { %1405 = vmatpush1.bf16.msra.mxu0 %v2717_v9 }
0x158b   :  { %1566 = vmatprep.subr.bf16.mxu0 %v2691_v40 }
0x1650   :  { %v1256_v30 = vpop.f32.mrb[24].mxu0 }
0x1651   :  { %v1258_v33 = vpop.f32.mrb[25].mxu0  ;;  %v1265_v11 = vrot.slane %v1256_v30, 6 }
0x1652   :  { %v1266_v34 = vrot.slane %v1258_v33, 6  ;;  %v1260_v35 = vpop.f32.mrb[26].mxu0 }
0x1653   :  { %v1261_v37 = vpop.f32.mrb[27].mxu0  ;;  %v1269_v43 = vadd.f32 %v1265_v11, %v2778_v22 }
0x1654   :  { %v1270_v39 = vadd.f32 %v1266_v34, %v2770_v60 }
0x1655   :  { %v2071_v32 = vmul.f32 -1.442695, %v1269_v43 }
0x1656   :  { %2326 = vtanh.f32 %v1270_v39  ;;  %v2072_v52 = vmul.f32 -1.442695, %v1270_v39 }
0x1657   :  { %2328 = vpow2.f32 %v2071_v32 }
0x1660   :  { %v2327_v36 = vpop.eup %2326 }
0x1661   :  { %1289 = vrot.lane.b32.xlu1 %v2327_v36, %s2467_s28  ;;  %v2329_v57 = vpop.eup %2328 }
0x1662   :  { %v1277_v45 = vadd.f32 1.0, %v2329_v57 }
0x1664   :  { %2330 = vrcp.f32 %v1277_v45 }
0x166e   :  { %v2331_v46 = vpop.eup %2330 }
0x166f   :  { %v1287_v41 = vmul.f32 %v2331_v46, %v1285_v1 }
0x16d3   :  { %v1290_v48 = vpop.permute.xlu1 %1289 }
0x16d4   :  { %v1292_v49 = vmul.f32 %v2331_v46, %v1290_v48 }
0x16d6   :  { %1294 = vrot.lane.b32.xlu0 %v1292_v49, %s2467_s28 }
0x1748   :  { %v1295_v13 = vpop.permute.xlu0 %1294 }
0x1749   :  { %v1297_v50 = vadd.f32 %v1295_v13, %v1287_v41 }
0x174b   :  { %2332 = vtanh.f32 %v1297_v50  ;;  %v1373_v26 = vrot.slane %v1297_v50, 6 }
0x174c   :  { %2334 = vpow2.f32 %v2072_v52 }
0x1755   :  { %v2333_v51 = vpop.eup %2332 }
0x1756   :  { %1300 = vrot.lane.b32.xlu1 %v2333_v51, %s2467_s28  ;;  %v2335_v53 = vpop.eup %2334 }
0x1757   :  { %v1278_v54 = vadd.f32 1.0, %v2335_v53 }
0x1759   :  { %2336 = vrcp.f32 %v1278_v54 }
0x1763   :  { %v2337_v55 = vpop.eup %2336 }
0x17c8   :  { %v1301_v56 = vpop.permute.xlu1 %1300 }
0x17c9   :  { %v1303_v58 = vmul.f32 %v2337_v55, %v1301_v56 }
0x17cb   :  { %v1304_v59 = vpack.c.bf16 %v1303_v58, %v1303_v58 }
0x17cd   :  { %v1306_v62 = vrot.slane %v1304_v59, 1 }
0x17cf   :  { %2073 = vmatmul.mubr.msk.bf16.vlgmr.msra.gmra.mrb[20].mxu1 %vm113_vm0, %v1306_v62 }
0x17d0   :  { %1487 = vmatpush1.bf16.msra.mxu1 %v2695_v42  ;;  %1518 = vmatprep.mubr.bf16.mxu1 %v2466_v0 }
0x17d1   :  { %1488 = vmatprep.subr.bf16.mxu1 %v2698_v44 }
0x17d4   :  { %1489 = vmatpush1.bf16.msra.mxu1 %v2702_v47 }
0x17d5   :  { %1490 = vmatprep.subr.bf16.mxu1 %v2709_v61 }
0x17d8   :  { %1491 = vmatpush1.bf16.msra.mxu1 %v2711_v63 }
0x17d9   :  { %1492 = vmatprep.subr.bf16.mxu1 %v2715_v5 }
0x17dc   :  { %1493 = vmatpush1.bf16.msra.mxu1 %v2717_v9 }
0x17dd   :  { %1654 = vmatprep.subr.bf16.mxu1 %v2691_v40 }
0x18a2   :  { %v1344_v7 = vpop.f32.mrb[20].mxu1 }
0x18a3   :  { %v1346_v15 = vpop.f32.mrb[21].mxu1  ;;  %v1353_v8 = vrot.slane %v1344_v7, 4 }
0x18a4   :  { %v1354_v18 = vrot.slane %v1346_v15, 4  ;;  %v1348_v21 = vpop.f32.mrb[22].mxu1 }
0x18a5   :  { %v1349_v4 = vpop.f32.mrb[23].mxu1  ;;  %v1357_v10 = vadd.f32 %v1353_v8, %v2778_v22 }
0x18a6   :  { %v1358_v23 = vadd.f32 %v1354_v18, %v2770_v60 }
0x18a7   :  { %v2074_v12 = vmul.f32 -1.442695, %v1357_v10 }
0x18a8   :  { %2338 = vtanh.f32 %v1358_v23  ;;  %v2075_v31 = vmul.f32 -1.442695, %v1358_v23 }
0x18a9   :  { %2340 = vpow2.f32 %v2074_v12 }
0x18b2   :  { %v2339_v6 = vpop.eup %2338 }
0x18b3   :  { %1377 = vrot.lane.b32.xlu0 %v2339_v6, %s2467_s28  ;;  %v2341_v14 = vpop.eup %2340 }
0x18b4   :  { %v1365_v16 = vadd.f32 1.0, %v2341_v14 }
0x18b6   :  { %2342 = vrcp.f32 %v1365_v16 }
0x18c0   :  { %v2343_v24 = vpop.eup %2342 }
0x18c1   :  { %v1375_v27 = vmul.f32 %v2343_v24, %v1373_v26 }
0x1925   :  { %v1378_v25 = vpop.permute.xlu0 %1377 }
0x1926   :  { %v1380_v2 = vmul.f32 %v2343_v24, %v1378_v25 }
0x1928   :  { %1382 = vrot.lane.b32.xlu1 %v1380_v2, %s2467_s28 }
0x199a   :  { %v1383_v28 = vpop.permute.xlu1 %1382 }
0x199b   :  { %v1385_v38 = vadd.f32 %v1383_v28, %v1375_v27 }
0x199d   :  { %2344 = vtanh.f32 %v1385_v38  ;;  %v1461_v53 = vrot.slane %v1385_v38, 6 }
0x199e   :  { %2346 = vpow2.f32 %v2075_v31 }
0x19a7   :  { %v2345_v29 = vpop.eup %2344 }
0x19a8   :  { %1388 = vrot.lane.b32.xlu0 %v2345_v29, %s2467_s28  ;;  %v2347_v30 = vpop.eup %2346 }
0x19a9   :  { %v1366_v33 = vadd.f32 1.0, %v2347_v30 }
0x19ab   :  { %2348 = vrcp.f32 %v1366_v33 }
0x19b5   :  { %v2349_v34 = vpop.eup %2348 }
0x1a1a   :  { %v1389_v35 = vpop.permute.xlu0 %1388 }
0x1a1b   :  { %v1391_v37 = vmul.f32 %v2349_v34, %v1389_v35 }
0x1a1d   :  { %v1392_v39 = vpack.c.bf16 %v1391_v37, %v1391_v37 }
0x1a1f   :  { %v1394_v36 = vrot.slane %v1392_v39, 2 }
0x1a21   :  { %2076 = vmatmul.mubr.msk.bf16.vlgmr.msra.gmra.mrb[28].mxu0 %vm113_vm0, %v1394_v36 }
0x1a22   :  { %1567 = vmatpush1.bf16.msra.mxu0 %v2695_v42  ;;  %1598 = vmatprep.mubr.bf16.mxu0 %v2466_v0 }
0x1a23   :  { %1568 = vmatprep.subr.bf16.mxu0 %v2698_v44 }
0x1a26   :  { %1569 = vmatpush1.bf16.msra.mxu0 %v2702_v47 }
0x1a27   :  { %1570 = vmatprep.subr.bf16.mxu0 %v2709_v61 }
0x1a2a   :  { %1571 = vmatpush1.bf16.msra.mxu0 %v2711_v63 }
0x1a2b   :  { %1572 = vmatprep.subr.bf16.mxu0 %v2715_v5 }
0x1a2e   :  { %1573 = vmatpush1.bf16.msra.mxu0 %v2717_v9 }
0x1a2f   :  { %1742 = vmatprep.subr.bf16.mxu0 %v2691_v40 }
0x1af4   :  { %v1432_v11 = vpop.f32.mrb[28].mxu0 }
0x1af5   :  { %v1434_v43 = vpop.f32.mrb[29].mxu0  ;;  %v1441_v49 = vrot.slane %v1432_v11, 2 }
0x1af6   :  { %v1442_v32 = vrot.slane %v1434_v43, 2  ;;  %v1436_v57 = vpop.f32.mrb[30].mxu0 }
0x1af7   :  { %v1437_v45 = vpop.f32.mrb[31].mxu0  ;;  %v1445_v1 = vadd.f32 %v1441_v49, %v2778_v22 }
0x1af8   :  { %v1446_v46 = vadd.f32 %v1442_v32, %v2770_v60 }
0x1af9   :  { %v2077_v41 = vmul.f32 -1.442695, %v1445_v1 }
0x1afa   :  { %2350 = vtanh.f32 %v1446_v46  ;;  %v2078_v58 = vmul.f32 -1.442695, %v1446_v46 }
0x1afb   :  { %2352 = vpow2.f32 %v2077_v41 }
0x1b04   :  { %v2351_v48 = vpop.eup %2350 }
0x1b05   :  { %1465 = vrot.lane.b32.xlu1 %v2351_v48, %s2467_s28  ;;  %v2353_v13 = vpop.eup %2352 }
0x1b06   :  { %v1453_v50 = vadd.f32 1.0, %v2353_v13 }
0x1b08   :  { %2354 = vrcp.f32 %v1453_v50 }
0x1b12   :  { %v2355_v40 = vpop.eup %2354 }
0x1b13   :  { %v1463_v54 = vmul.f32 %v2355_v40, %v1461_v53 }
0x1b77   :  { %v1466_v51 = vpop.permute.xlu1 %1465 }
0x1b78   :  { %v1468_v52 = vmul.f32 %v2355_v40, %v1466_v51 }
0x1b7a   :  { %1470 = vrot.lane.b32.xlu0 %v1468_v52, %s2467_s28 }
0x1bec   :  { %v1471_v60 = vpop.permute.xlu0 %1470 }
0x1bed   :  { %v1473_v55 = vadd.f32 %v1471_v60, %v1463_v54 }
0x1bef   :  { %2356 = vtanh.f32 %v1473_v55  ;;  %v1543_v28 = vrot.slane %v1473_v55, 6 }
0x1bf0   :  { %2358 = vpow2.f32 %v2078_v58 }
0x1bf9   :  { %v2357_v56 = vpop.eup %2356 }
0x1bfa   :  { %1476 = vrot.lane.b32.xlu1 %v2357_v56, %s2467_s28  ;;  %v2359_v22 = vpop.eup %2358 }
0x1bfb   :  { %v1454_v59 = vadd.f32 1.0, %v2359_v22 }
0x1bfd   :  { %2360 = vrcp.f32 %v1454_v59 }
0x1c07   :  { %v2361_v62 = vpop.eup %2360 }
0x1c6c   :  { %v1477_v7 = vpop.permute.xlu1 %1476 }
0x1c6d   :  { %v1479_v15 = vmul.f32 %v2361_v62, %v1477_v7 }
0x1c6f   :  { %v1480_v18 = vpack.c.bf16 %v1479_v15, %v1479_v15 }
0x1c71   :  { %v1482_v21 = vrot.slane %v1480_v18, 3 }
0x1c73   :  { %2079 = vmatmul.mubr.msk.bf16.vlgmr.msra.gmra.mrb[24].mxu1 %vm113_vm0, %v1482_v21 }
0x1c74   :  { %1655 = vmatpush1.bf16.msra.mxu1 %v2695_v42  ;;  %1686 = vmatprep.mubr.bf16.mxu1 %v2466_v0 }
0x1c75   :  { %1656 = vmatprep.subr.bf16.mxu1 %v2698_v44 }
0x1c78   :  { %1657 = vmatpush1.bf16.msra.mxu1 %v2702_v47 }
0x1c79   :  { %1658 = vmatprep.subr.bf16.mxu1 %v2709_v61 }
0x1c7c   :  { %1659 = vmatpush1.bf16.msra.mxu1 %v2711_v63 }
0x1c7d   :  { %1660 = vmatprep.subr.bf16.mxu1 %v2715_v5 }
0x1c80   :  { %1661 = vmatpush1.bf16.msra.mxu1 %v2717_v9 }
0x1d46   :  { %v1520_v4 = vpop.f32.mrb[24].mxu1 }
0x1d47   :  { %v1522_v23 = vpop.f32.mrb[25].mxu1  ;;  %v1527_v14 = vadd.f32 %v1520_v4, %v2772_v3 }
0x1d48   :  { %v1528_v6 = vadd.f32 %v1522_v23, %v2775_v17  ;;  %v1524_v8 = vpop.f32.mrb[26].mxu1 }
0x1d49   :  { %v1525_v10 = vpop.f32.mrb[27].mxu1  ;;  %v2080_v16 = vmul.f32 -1.442695, %v1527_v14 }
0x1d4a   :  { %2362 = vtanh.f32 %v1528_v6  ;;  %v2081_v33 = vmul.f32 -1.442695, %v1528_v6 }
0x1d4b   :  { %2364 = vpow2.f32 %v2080_v16 }
0x1d54   :  { %v2363_v12 = vpop.eup %2362 }
0x1d55   :  { %1547 = vrot.lane.b32.xlu0 %v2363_v12, %s2467_s28  ;;  %v2365_v24 = vpop.eup %2364 }
0x1d56   :  { %v1535_v25 = vadd.f32 1.0, %v2365_v24 }
0x1d58   :  { %2366 = vrcp.f32 %v1535_v25 }
0x1d62   :  { %v2367_v2 = vpop.eup %2366 }
0x1d63   :  { %v1545_v38 = vmul.f32 %v2367_v2, %v1543_v28 }
0x1dc7   :  { %v1548_v26 = vpop.permute.xlu0 %1547 }
0x1dc8   :  { %v1550_v27 = vmul.f32 %v2367_v2, %v1548_v26 }
0x1dca   :  { %1552 = vrot.lane.b32.xlu1 %v1550_v27, %s2467_s28 }
0x1e3c   :  { %v1553_v29 = vpop.permute.xlu1 %1552 }
0x1e3d   :  { %v1555_v31 = vadd.f32 %v1553_v29, %v1545_v38 }
0x1e3f   :  { %2368 = vtanh.f32 %v1555_v31  ;;  %v1629_v41 = vrot.slane %v1555_v31, 6 }
0x1e40   :  { %2370 = vpow2.f32 %v2081_v33 }
0x1e49   :  { %v2369_v30 = vpop.eup %2368 }
0x1e4a   :  { %1558 = vrot.lane.b32.xlu0 %v2369_v30, %s2467_s28  ;;  %v2371_v34 = vpop.eup %2370 }
0x1e4b   :  { %v1536_v35 = vadd.f32 1.0, %v2371_v34 }
0x1e4d   :  { %2372 = vrcp.f32 %v1536_v35 }
0x1e57   :  { %v2373_v37 = vpop.eup %2372 }
0x1ebc   :  { %v1559_v39 = vpop.permute.xlu0 %1558 }
0x1ebd   :  { %v1561_v36 = vmul.f32 %v2373_v37, %v1559_v39 }
0x1ebf   :  { %v1562_v11 = vpack.c.bf16 %v1561_v36, %v1561_v36 }
0x1ec1   :  { %2082 = vmatmul.mubr.msk.bf16.vlgmr.msra.gmra.mrb[32].mxu0 %vm113_vm0, %v1562_v11 }
0x1ec2   :  { %1743 = vmatpush1.bf16.msra.mxu0 %v2695_v42  ;;  %1774 = vmatprep.mubr.bf16.mxu0 %v2466_v0 }
0x1ec3   :  { %1744 = vmatprep.subr.bf16.mxu0 %v2698_v44 }
0x1ec6   :  { %1745 = vmatpush1.bf16.msra.mxu0 %v2702_v47 }
0x1ec7   :  { %1746 = vmatprep.subr.bf16.mxu0 %v2709_v61 }
0x1eca   :  { %1747 = vmatpush1.bf16.msra.mxu0 %v2711_v63 }
0x1ecb   :  { %1748 = vmatprep.subr.bf16.mxu0 %v2715_v5 }
0x1ece   :  { %1749 = vmatpush1.bf16.msra.mxu0 %v2717_v9 }
0x1f94   :  { %v1600_v43 = vpop.f32.mrb[32].mxu0 }
0x1f95   :  { %v1602_v32 = vpop.f32.mrb[33].mxu0  ;;  %v1609_v44 = vrot.slane %v1600_v43, 6 }
0x1f96   :  { %v1610_v57 = vrot.slane %v1602_v32, 6  ;;  %v1604_v45 = vpop.f32.mrb[34].mxu0 }
0x1f97   :  { %v1605_v46 = vpop.f32.mrb[35].mxu0  ;;  %v1613_v47 = vadd.f32 %v1609_v44, %v2772_v3 }
0x1f98   :  { %v1614_v42 = vadd.f32 %v1610_v57, %v2775_v17 }
0x1f99   :  { %v2083_v61 = vmul.f32 -1.442695, %v1613_v47 }
0x1f9a   :  { %2374 = vtanh.f32 %v1614_v42  ;;  %v2084_v52 = vmul.f32 -1.442695, %v1614_v42 }
0x1f9b   :  { %2376 = vpow2.f32 %v2083_v61 }
0x1fa4   :  { %v2375_v48 = vpop.eup %2374 }
0x1fa5   :  { %1633 = vrot.lane.b32.xlu1 %v2375_v48, %s2467_s28  ;;  %v2377_v63 = vpop.eup %2376 }
0x1fa6   :  { %v1621_v5 = vadd.f32 1.0, %v2377_v63 }
0x1fa8   :  { %2378 = vrcp.f32 %v1621_v5 }
0x1fb2   :  { %v2379_v9 = vpop.eup %2378 }
0x1fb3   :  { %v1631_v13 = vmul.f32 %v2379_v9, %v1629_v41  ;;  %v2196_v41 = vld [vmem:[#allocation2 + $0x144] ss:$8 sps:$4 sm:$0xff]  }
0x1fb4   :  { %1929 = vmatprep.subr.bf16.mxu1 %v2196_v41 }
0x2017   :  { %v1634_v49 = vpop.permute.xlu1 %1633 }
0x2018   :  { %v1636_v1 = vmul.f32 %v2379_v9, %v1634_v49 }
0x201a   :  { %1638 = vrot.lane.b32.xlu0 %v1636_v1, %s2467_s28  ;;  %v2194_v1 = vld [vmem:[#allocation2 + $0x140] ss:$8 sps:$4 sm:$0xff]  }
0x208c   :  { %v1639_v50 = vpop.permute.xlu0 %1638 }
0x208d   :  { %v1641_v40 = vadd.f32 %v1639_v50, %v1631_v13  ;;  %v2199_v13 = vld [vmem:[#allocation2 + $0x154] ss:$8 sps:$4 sm:$0xff]   ;;  %v2202_v50 = vld [vmem:[#allocation2 + $0x164] ss:$8 sps:$4 sm:$0xff]  }
0x208f   :  { %2380 = vtanh.f32 %v1641_v40  ;;  %v1717_v24 = vrot.slane %v1641_v40, 6  ;;  %v2200_v40 = vld [vmem:[#allocation2 + $0x160] ss:$8 sps:$4 sm:$0xff]  }
0x2090   :  { %2382 = vpow2.f32 %v2084_v52 }
0x2099   :  { %v2381_v51 = vpop.eup %2380 }
0x209a   :  { %1644 = vrot.lane.b32.xlu1 %v2381_v51, %s2467_s28  ;;  %v2383_v53 = vpop.eup %2382  ;;  %v2205_v51 = vld [vmem:[#allocation2 + $0x174] ss:$8 sps:$4 sm:$0xff]  }
0x209b   :  { %v1622_v54 = vadd.f32 1.0, %v2383_v53  ;;  %v2203_v53 = vld [vmem:[#allocation2 + $0x170] ss:$8 sps:$4 sm:$0xff]  }
0x209d   :  { %2384 = vrcp.f32 %v1622_v54  ;;  %v2208_v54 = vld [vmem:[#allocation2 + $0x184] ss:$8 sps:$4 sm:$0xff]  }
0x20a7   :  { %v2385_v60 = vpop.eup %2384 }
0x210c   :  { %v1645_v55 = vpop.permute.xlu1 %1644 }
0x210d   :  { %v1647_v56 = vmul.f32 %v2385_v60, %v1645_v55  ;;  %v2206_v60 = vld [vmem:[#allocation2 + $0x180] ss:$8 sps:$4 sm:$0xff]   ;;  %v2211_v55 = vld [vmem:[#allocation2 + $0x194] ss:$8 sps:$4 sm:$0xff]  }
0x210f   :  { %v1648_v58 = vpack.c.bf16 %v1647_v56, %v1647_v56  ;;  %v2209_v56 = vld [vmem:[#allocation2 + $0x190] ss:$8 sps:$4 sm:$0xff]  }
0x2111   :  { %v1650_v22 = vrot.slane %v1648_v58, 1  ;;  %v2214_v58 = vld [vmem:[#allocation2 + $0x1a4] ss:$8 sps:$4 sm:$0xff]  }
0x2113   :  { %2085 = vmatmul.mubr.msk.bf16.vlgmr.msra.gmra.mrb[28].mxu1 %vm113_vm0, %v1650_v22  ;;  %v2212_v22 = vld [vmem:[#allocation2 + $0x1a0] ss:$8 sps:$4 sm:$0xff]  }
0x2114   :  { %1961 = vmatprep.mubr.bf16.mxu1 %v2466_v0  ;;  %1930 = vmatpush1.bf16.msra.mxu1 %v2194_v1 }
0x2115   :  { %1931 = vmatprep.subr.bf16.mxu1 %v2199_v13 }
0x21e6   :  { %v1688_v59 = vpop.f32.mrb[28].mxu1 }
0x21e7   :  { %v1690_v62 = vpop.f32.mrb[29].mxu1  ;;  %v1697_v23 = vrot.slane %v1688_v59, 4 }
0x21e8   :  { %v1698_v7 = vrot.slane %v1690_v62, 4  ;;  %v1692_v15 = vpop.f32.mrb[30].mxu1 }
0x21e9   :  { %v1693_v18 = vpop.f32.mrb[31].mxu1  ;;  %v1701_v6 = vadd.f32 %v1697_v23, %v2772_v3  ;;  %v2217_v15 = vld [vmem:[#allocation2 + $0x1b4] ss:$8 sps:$4 sm:$0xff]  }
0x21ea   :  { %v1702_v21 = vadd.f32 %v1698_v7, %v2775_v17  ;;  %v2215_v18 = vld [vmem:[#allocation2 + $0x1b0] ss:$8 sps:$4 sm:$0xff]  }
0x21eb   :  { %v2086_v8 = vmul.f32 -1.442695, %v1701_v6 }
0x21ec   :  { %2386 = vtanh.f32 %v1702_v21  ;;  %v2087_v28 = vmul.f32 -1.442695, %v1702_v21 }
0x21ed   :  { %2388 = vpow2.f32 %v2086_v8 }
0x21f6   :  { %v2387_v4 = vpop.eup %2386 }
0x21f7   :  { %1721 = vrot.lane.b32.xlu0 %v2387_v4, %s2467_s28  ;;  %v2389_v10 = vpop.eup %2388 }
0x21f8   :  { %v1709_v12 = vadd.f32 1.0, %v2389_v10 }
0x21fa   :  { %2390 = vrcp.f32 %v1709_v12 }
0x2204   :  { %v2391_v0 = vpop.eup %2390 }
0x2205   :  { %v1719_v25 = vmul.f32 %v2391_v0, %v1717_v24 }
0x2269   :  { %v1722_v14 = vpop.permute.xlu0 %1721 }
0x226a   :  { %v1724_v16 = vmul.f32 %v2391_v0, %v1722_v14  ;;  %v1971_v0 = vsub.s32 2, %v2552_v19  ;;  %v2414_v14 = vld [vmem:[%s2893_s2] sm:$0x77]  ;;  %s2468_s2 = smov [#allocation5]  }
0x226b   :  { %s1994_s4 = sshll.u32 %s2468_s2, 4  ;;  %s1995_s4 = int_to_ptr.vmem [resolvable:$true] %s1994_s4 }
0x226c   :  { %1726 = vrot.lane.b32.xlu1 %v1724_v16, %s2467_s28  ;;  %v1972_v16 = vrot.slane %v2414_v14, %v1971_v0  ;;  %s2437_s5 = scalar_lea.vmem %s1995_s4, 32  ;;  %p2442_p9 = scmp.lt.s32.totalorder %s1995_s4, %s1995_s4 }
0x226d   :  { %p2438_p8 = scmp.ne.s32.totalorder %s1995_s4, %s2437_s5  ;;  %p2443_p10 = scmp.lt.s32.totalorder %s2437_s5, %s2437_s5 }
0x226f   :  { %p2444_p11 = por %p2443_p10, %p2442_p9 }
0x2271   :  { %p2445_p12 = pnand %p2444_p11, %p2438_p8 }
0x22de   :  { %v1727_v2 = vpop.permute.xlu1 %1726 }
0x22df   :  { %v1729_v26 = vadd.f32 %v1727_v2, %v1719_v25 }
0x22e1   :  { %2392 = vtanh.f32 %v1729_v26  ;;  %v1805_v5 = vrot.slane %v1729_v26, 6 }
0x22e2   :  { %2394 = vpow2.f32 %v2087_v28 }
0x22eb   :  { %v2393_v27 = vpop.eup %2392 }
0x22ec   :  { %1732 = vrot.lane.b32.xlu0 %v2393_v27, %s2467_s28  ;;  %v2395_v38 = vpop.eup %2394 }
0x22ed   :  { %v1710_v29 = vadd.f32 1.0, %v2395_v38 }
0x22ef   :  { %2396 = vrcp.f32 %v1710_v29 }
0x22f9   :  { %v2397_v31 = vpop.eup %2396 }
0x235e   :  { %v1733_v30 = vpop.permute.xlu0 %1732 }
0x235f   :  { %v1735_v33 = vmul.f32 %v2397_v31, %v1733_v30 }
0x2361   :  { %v1736_v34 = vpack.c.bf16 %v1735_v33, %v1735_v33 }
0x2363   :  { %v1738_v35 = vrot.slane %v1736_v34, 2 }
0x2365   :  { %2088 = vmatmul.mubr.msk.bf16.vlgmr.msra.gmra.mrb[36].mxu0 %vm113_vm0, %v1738_v35 }
0x2438   :  { %v1776_v37 = vpop.f32.mrb[36].mxu0 }
0x2439   :  { %v1778_v39 = vpop.f32.mrb[37].mxu0  ;;  %v1785_v45 = vrot.slane %v1776_v37, 2 }
0x243a   :  { %v1786_v36 = vrot.slane %v1778_v39, 2  ;;  %v1780_v11 = vpop.f32.mrb[38].mxu0 }
0x243b   :  { %v1781_v43 = vpop.f32.mrb[39].mxu0  ;;  %v1789_v46 = vadd.f32 %v1785_v45, %v2772_v3  ;;  %v2197_v3 = vld [vmem:[#allocation2 + $0x150] ss:$8 sps:$4 sm:$0xff]  }
0x243c   :  { %v1790_v32 = vadd.f32 %v1786_v36, %v2775_v17  ;;  %1932 = vmatpush1.bf16.msra.mxu1 %v2197_v3 }
0x243d   :  { %v2089_v42 = vmul.f32 -1.442695, %v1789_v46  ;;  %1933 = vmatprep.subr.bf16.mxu1 %v2202_v50 }
0x243e   :  { %2398 = vtanh.f32 %v1790_v32  ;;  %v2090_v59 = vmul.f32 -1.442695, %v1790_v32 }
0x243f   :  { %2400 = vpow2.f32 %v2089_v42 }
0x2440   :  { %1934 = vmatpush1.bf16.msra.mxu1 %v2200_v40 }
0x2441   :  { %1935 = vmatprep.subr.bf16.mxu1 %v2205_v51 }
0x2444   :  { %1936 = vmatpush1.bf16.msra.mxu1 %v2203_v53 }
0x2445   :  { %1937 = vmatprep.subr.bf16.mxu1 %v2208_v54 }
0x2448   :  { %v2399_v57 = vpop.eup %2398  ;;  %1938 = vmatpush1.bf16.msra.mxu1 %v2206_v60 }
0x2449   :  { %1809 = vrot.lane.b32.xlu1 %v2399_v57, %s2467_s28  ;;  %v2401_v48 = vpop.eup %2400  ;;  %1939 = vmatprep.subr.bf16.mxu1 %v2211_v55 }
0x244a   :  { %v1797_v44 = vadd.f32 1.0, %v2401_v48 }
0x244c   :  { %2402 = vrcp.f32 %v1797_v44  ;;  %1940 = vmatpush1.bf16.msra.mxu1 %v2209_v56 }
0x244d   :  { %1941 = vmatprep.subr.bf16.mxu1 %v2214_v58 }
0x2450   :  { %1942 = vmatpush1.bf16.msra.mxu1 %v2212_v22 }
0x2451   :  { %1943 = vmatprep.subr.bf16.mxu1 %v2217_v15 }
0x2454   :  { %1944 = vmatpush1.bf16.msra.mxu1 %v2215_v18 }
0x2456   :  { %v2403_v47 = vpop.eup %2402 }
0x2457   :  { %v1807_v9 = vmul.f32 %v2403_v47, %v1805_v5 }
0x24bb   :  { %v1810_v61 = vpop.permute.xlu1 %1809 }
0x24bc   :  { %v1812_v63 = vmul.f32 %v2403_v47, %v1810_v61 }
0x24be   :  { %1814 = vrot.lane.b32.xlu0 %v1812_v63, %s2467_s28 }
0x2530   :  { %v1815_v17 = vpop.permute.xlu0 %1814 }
0x2531   :  { %v1817_v49 = vadd.f32 %v1815_v17, %v1807_v9 }
0x2533   :  { %2404 = vtanh.f32 %v1817_v49 }
0x2534   :  { %2406 = vpow2.f32 %v2090_v59 }
0x253d   :  { %v2405_v52 = vpop.eup %2404 }
0x253e   :  { %1820 = vrot.lane.b32.xlu1 %v2405_v52, %s2467_s28  ;;  %v2407_v62 = vpop.eup %2406 }
0x253f   :  { %v1798_v7 = vadd.f32 1.0, %v2407_v62 }
0x2541   :  { %2408 = vrcp.f32 %v1798_v7 }
0x254b   :  { %v2409_v21 = vpop.eup %2408 }
0x25b0   :  { %v1821_v4 = vpop.permute.xlu1 %1820 }
0x25b1   :  { %v1823_v23 = vmul.f32 %v2409_v21, %v1821_v4 }
0x25b3   :  { %1825 = vrot.lane.b32.xlu0 %v1823_v23, %s2467_s28 }
0x2625   :  { %v1826_v6 = vpop.permute.xlu0 %1825 }
0x2626   :  { %v1828_v8 = vsel %vm113_vm0, %v2720_v20, %v1826_v6 }
0x2627   :  { %v1829_v10 = vpack.c.bf16 %v1828_v8, %v1828_v8 }
0x2629   :  { %v1847_v12 = vrot.slane %v1829_v10, 3 }
0x262b   :  { %1962 = vmatmul.mubr.bf16.vlgmr.msra.gmra.mrb[32].mxu1 %v1847_v12 }
0x26fe   :  { %v1963_v24 = vpop.f32.mrb[32].mxu1 }
0x26ff   :  { %v1973_v25 = vadd.f32 %v1972_v16, %v1963_v24  ;;  %v1965_v2 = vpop.f32.mrb[33].mxu1 }
0x2700   :  { %v1966_v26 = vpop.f32.mrb[34].mxu1 }
0x2701   :  { %v1967_v27 = vpop.f32.mrb[35].mxu1  ;;  %v1975_v28 = vsel %vm1974_vm4, %v1973_v25, -inf }
0x2702   :  { %1976 = vmax.xlane.f32.xlu1 %v1975_v28 }
0x278f   :  { %v1977_v20 = vpop.xlane.xlu1 %1976 }
0x2790   :  { %v1978_v38 = vsub.f32 %v1973_v25, %v1977_v20 }
0x2792   :  { %v1979_v29 = vmul.f32 1.442695, %v1978_v38 }
0x2794   :  { %2410 = vpow2.f32 %v1979_v29 }
0x279e   :  { %v2411_v31 = vpop.eup %2410 }
0x279f   :  { %v1981_v19 = vsel %vm1974_vm4, %v2411_v31, 0.0 }
0x27a0   :  { %1982 = vadd.xlane.f32.xlu0 %v1981_v19 }
0x282d   :  { %v1983_v30 = vpop.xlane.xlu0 %1982 }
0x282e   :  { %2412 = vlog2.f32 %v1983_v30 }
0x2838   :  { %v2413_v33 = vpop.eup %2412 }
0x2839   :  { %v1985_v34 = vmul.f32 0.6931472, %v2413_v33 }
0x283b   :  { %v1986_v35 = vsub.f32 %v1978_v38, %v1985_v34 }
0x283d   :  { %1987 = vst.msk [vmem:[#allocation5] sm:$0x3] %vm1974_vm4, %v1986_v35 }
0x283e   :  { %2448 = shalt.err (!%p2445_p12)
}
0x283f   :  { %s2449_s8 = scalar_lea.hbm %s2894_s3, 32 }
0x2840   :  { %p2450_p13 = scmp.ne.s32.totalorder %s2894_s3, %s2449_s8  ;;  %p2453_p0 = scmp.lt.u32.totalorder %s2449_s8, %s2894_s3 }
0x2842   :  { %p2455_p1 = pnand %p2453_p0, %p2450_p13 }
0x2844   :  { %2458 = shalt.err (!%p2455_p1)
}
0x2845   :  { %1997 = dma.vmem_to_hbm [thread:$0]  %s1995_s4, 32, %s2894_s3, [#allocation4]  }
0x2846   :  { %2461 = dma.done.wait [#allocation4], 32  }
0x2847   :  { %2462 = vsyncadd [#allocation4], 4294967264 }
0x2848   :  { %2001 = vsyncpa [#allocation3], 1 }
0x2849   :  { %2002 = vsyncpa [#allocation4], 1 }

</bundles_post_ra>
